<compile_context>
chip_gen: v5e
topology: v5e:2x2
jax: 0.10.0
libtpu: 0.0.40
codegen_flags: <defaults>
</compile_context>

<pallas_src>
import jax
import jax.numpy as jnp
from jax.experimental import pallas as pl
from jax.experimental.pallas import tpu as pltpu

MATMUL_DTYPE = jnp.bfloat16          # matmul operand dtype (accumulation is f32)
_VMEM_LIMIT = 32 * 1024 * 1024       # safe on v5e/v6e/v7x; well above our ~5 MiB use


def _round_up(x, m):
    return (x + m - 1) // m * m


def _choose_tile(rows, tile_max):
    tile = min(tile_max, _round_up(rows, 8))   # always a multiple of 8
    return tile, _round_up(rows, tile)


# ----------------------------------------------------------------------------
# Pallas kernels
# ----------------------------------------------------------------------------
def _conv_pool_relu_kernel(p_ref, w_ref, b_ref, o_ref):
    """Fused conv (im2col matmul) + bias + 2x2 max-pool + ReLU for one row tile.

    p_ref: (4, TM, K) bf16 -- 4 pooling phases of im2col patches for TM outputs
    w_ref: (K, C)     bf16 -- conv weights reshaped to a matmul operand
    b_ref: (1, C)     f32  -- conv bias
    o_ref: (TM, C)    bf16 -- pooled, ReLU'd activations
    """
    nph, tm, _ = p_ref.shape
    # One long MXU matmul over all phases (keeps the systolic array fed);
    # the pool-max reduction runs on the VPU which has slack.
    p = jnp.concatenate([p_ref[i] for i in range(nph)], axis=0)        # (4*TM, K)
    acc = jnp.dot(p, w_ref[...], preferred_element_type=jnp.float32)   # (4*TM, C)
    pooled = acc[0:tm]
    for i in range(1, nph):
        pooled = jnp.maximum(pooled, acc[i * tm:(i + 1) * tm])
    # bias is constant over the pool window -> max(conv) + b == max(conv + b)
    o_ref[...] = jnp.maximum(pooled + b_ref[...], 0.0).astype(o_ref.dtype)


def _mlp_logsoftmax_kernel(x_ref, w1_ref, b1_ref, w2_ref, b2_ref, o_ref):
    """fc1 -> ReLU -> fc2 -> log_softmax (over last dim) for one row tile."""
    h = jnp.dot(x_ref[...], w1_ref[...], preferred_element_type=jnp.float32)
    h = jnp.maximum(h + b1_ref[...], 0.0)
    logits = jnp.dot(h.astype(w2_ref.dtype), w2_ref[...],
                     preferred_element_type=jnp.float32) + b2_ref[...]
    m = jnp.max(logits, axis=-1, keepdims=True)
    lse = m + jnp.log(jnp.sum(jnp.exp(logits - m), axis=-1, keepdims=True))
    o_ref[...] = (logits - lse).astype(o_ref.dtype)


# ----------------------------------------------------------------------------
# pallas_call wrappers (gridded over rows, double-buffered pipelining)
# ----------------------------------------------------------------------------
def conv_pool_relu(phases, w_mat, bias, *, tile_max=1024):
    nph, M, K = phases.shape
    C = w_mat.shape[1]
    tm, m_pad = _choose_tile(M, tile_max)
    if m_pad != M:
        phases = jnp.pad(phases, ((0, 0), (0, m_pad - M), (0, 0)))
    grid = (m_pad // tm,)

    cost = pl.CostEstimate(
        flops=2 * nph * m_pad * K * C + 8 * m_pad * C,
        transcendentals=0,
        bytes_accessed=(phases.size * phases.dtype.itemsize
                        + w_mat.size * w_mat.dtype.itemsize
                        + bias.size * 4
                        + m_pad * C * 2),
    )

    out = pl.pallas_call(
        _conv_pool_relu_kernel,
        out_shape=jax.ShapeDtypeStruct((m_pad, C), MATMUL_DTYPE),
        grid=grid,
        in_specs=[
            pl.BlockSpec((nph, tm, K), lambda i: (0, i, 0)),
            pl.BlockSpec((K, C), lambda i: (0, 0)),
            pl.BlockSpec((1, C), lambda i: (0, 0)),
        ],
        out_specs=pl.BlockSpec((tm, C), lambda i: (i, 0)),
        compiler_params=pltpu.CompilerParams(
            dimension_semantics=("parallel",),
            vmem_limit_bytes=_VMEM_LIMIT,
        ),
        cost_estimate=cost,
    )(phases, w_mat, bias)
    return out[:M] if m_pad != M else out


def mlp_logsoftmax(x, w1t, b1, w2t, b2, *, tile_max=1024):
    N, D = x.shape
    H = w1t.shape[1]
    nclass = w2t.shape[1]
    tn, n_pad = _choose_tile(N, tile_max)
    if n_pad != N:
        x = jnp.pad(x, ((0, n_pad - N), (0, 0)))
    grid = (n_pad // tn,)

    cost = pl.CostEstimate(
        flops=2 * n_pad * (D * H + H * nclass),
        transcendentals=n_pad * (nclass + 1),
        bytes_accessed=(x.size * x.dtype.itemsize
                        + w1t.size * w1t.dtype.itemsize
                        + w2t.size * w2t.dtype.itemsize
                        + (H + nclass) * 4
                        + n_pad * nclass * 4),
    )

    out = pl.pallas_call(
        _mlp_logsoftmax_kernel,
        out_shape=jax.ShapeDtypeStruct((n_pad, nclass), jnp.float32),
        grid=grid,
        in_specs=[
            pl.BlockSpec((tn, D), lambda i: (i, 0)),
            pl.BlockSpec((D, H), lambda i: (0, 0)),
            pl.BlockSpec((1, H), lambda i: (0, 0)),
            pl.BlockSpec((H, nclass), lambda i: (0, 0)),
            pl.BlockSpec((1, nclass), lambda i: (0, 0)),
        ],
        out_specs=pl.BlockSpec((tn, nclass), lambda i: (i, 0)),
        compiler_params=pltpu.CompilerParams(
            dimension_semantics=("parallel",),
            vmem_limit_bytes=_VMEM_LIMIT,
        ),
        cost_estimate=cost,
    )(x, w1t, b1, w2t, b2)
    return out[:N] if n_pad != N else out


# ----------------------------------------------------------------------------
# JAX glue: im2col patch extraction, pooling-phase regrouping, param packing
# ----------------------------------------------------------------------------
def extract_patches(x_nhwc, ksize=5):
    """(N, H, W, C) -> (N, OH, OW, ksize*ksize*C), column order = (kh, kw, c)."""
    N, H, W, C = x_nhwc.shape
    OH, OW = H - ksize + 1, W - ksize + 1
    cols = []
    for kh in range(ksize):
        for kw in range(ksize):
            cols.append(x_nhwc[:, kh:kh + OH, kw:kw + OW, :])
    return jnp.concatenate(cols, axis=-1)


def make_pool_phases(patches):
    """(N, OH, OW, K) -> (4, N*(OH//2)*(OW//2), K): 4 phases of the 2x2 pool."""
    N, OH, OW, K = patches.shape
    PH, PW = OH // 2, OW // 2
    phases = []
    for a in range(2):
        for b in range(2):
            phases.append(patches[:, a::2, b::2, :].reshape(N * PH * PW, K))
    return jnp.stack(phases, axis=0)


def conv_weight_to_matmul(w, dtype):
    """PyTorch conv weight (oc, ic, kh, kw) -> matmul operand (kh*kw*ic, oc)."""
    oc, ic, kh, kw = w.shape
    return jnp.transpose(w, (2, 3, 1, 0)).reshape(kh * kw * ic, oc).astype(dtype)


def init_params(key, nclass=10, c=1):
    keys = jax.random.split(key, 8)
    scale = 0.1
    return {
        "conv1_w": scale * jax.random.normal(keys[0], (10, c, 5, 5), jnp.float32),
        "conv1_b": scale * jax.random.normal(keys[1], (10,), jnp.float32),
        "conv2_w": scale * jax.random.normal(keys[2], (20, 10, 5, 5), jnp.float32),
        "conv2_b": scale * jax.random.normal(keys[3], (20,), jnp.float32),
        "fc1_w": scale * jax.random.normal(keys[4], (50, 320), jnp.float32),
        "fc1_b": scale * jax.random.normal(keys[5], (50,), jnp.float32),
        "fc2_w": scale * jax.random.normal(keys[6], (nclass, 50), jnp.float32),
        "fc2_b": scale * jax.random.normal(keys[7], (nclass,), jnp.float32),
    }


def net_forward(x_nchw, params):
    """Replicates Net.forward (eval mode). x_nchw: (N, 1, 28, 28) float32."""
    N = x_nchw.shape[0]

    # --- pack weights: matmul operands in bf16, biases stay f32 ---
    w1m = conv_weight_to_matmul(params["conv1_w"], MATMUL_DTYPE)      # (25, 10)
    b1 = params["conv1_b"].reshape(1, -1).astype(jnp.float32)         # (1, 10)
    w2m = conv_weight_to_matmul(params["conv2_w"], MATMUL_DTYPE)      # (250, 20)
    b2 = params["conv2_b"].reshape(1, -1).astype(jnp.float32)         # (1, 20)

    # fc1: fold PyTorch's NCHW flatten (c, h, w order) into the weight packing so
    # the NHWC activations flatten directly (h, w, c order) -- no transpose op.
    fc1wt = params["fc1_w"].T                                          # (320, 50), rows (c,h,w)
    fc1wt = (fc1wt.reshape(20, 4, 4, 50)
                  .transpose(1, 2, 0, 3)
                  .reshape(320, 50)
                  .astype(MATMUL_DTYPE))                               # rows (h,w,c)
    fc1b = params["fc1_b"].reshape(1, -1).astype(jnp.float32)          # (1, 50)
    fc2wt = params["fc2_w"].T.astype(MATMUL_DTYPE)                     # (50, nclass)
    fc2b = params["fc2_b"].reshape(1, -1).astype(jnp.float32)          # (1, nclass)

    # --- conv1 + maxpool2 + relu ---
    x_nhwc = jnp.transpose(x_nchw, (0, 2, 3, 1)).astype(MATMUL_DTYPE)  # (N, 28, 28, 1)
    p1 = make_pool_phases(extract_patches(x_nhwc))                     # (4, N*144, 25)
    h1 = conv_pool_relu(p1, w1m, b1)                                   # (N*144, 10) bf16
    h1 = h1.reshape(N, 12, 12, 10)

    # --- conv2 + (dropout2d = identity) + maxpool2 + relu ---
    p2 = make_pool_phases(extract_patches(h1))                         # (4, N*16, 250)
    h2 = conv_pool_relu(p2, w2m, b2)                                   # (N*16, 20) bf16
    flat = h2.reshape(N, 320)                                          # (h, w, c) flatten

    # --- fc1 + relu + (dropout = identity) + fc2 + log_softmax ---
    return mlp_logsoftmax(flat, fc1wt, fc1b, fc2wt, fc2b)              # (N, nclass) f32


# ----------------------------------------------------------------------------
if __name__ == "__main__":
    key = jax.random.PRNGKey(0)
    x_key, p_key = jax.random.split(key)

    x = jax.random.normal(x_key, (2, 1, 28, 28), dtype=jnp.float32)
    params = init_params(p_key, nclass=10, c=1)

    out = jax.jit(net_forward)(x, params)
    out = jax.block_until_ready(out)

    assert out.shape == (2, 10), out.shape
    # log_softmax rows must exponentiate-sum to ~1 (computed in f32 in-kernel)
    row_sums = jnp.sum(jnp.exp(out), axis=-1)
    assert bool(jnp.all(jnp.isfinite(out)))
    assert bool(jnp.all(jnp.abs(row_sums - 1.0) < 1e-4)), row_sums

    print("KERNEL_OK")
</pallas_src>

<mosaic_0001>
module attributes {stable_mosaic.version = 11 : i64} {
  func.func @_conv_pool_relu_kernel(%arg0: i32, %arg1: memref<4x288x25xbf16, #tpu.memory_space<vmem>>, %arg2: memref<25x10xbf16, #tpu.memory_space<vmem>>, %arg3: memref<1x10xf32, #tpu.memory_space<vmem>>, %arg4: memref<288x10xbf16, #tpu.memory_space<vmem>>) attributes {dimension_semantics = [#tpu.dimension_semantics<parallel>], iteration_bounds = array<i64: 1>, scalar_prefetch = 0 : i64, scratch_operands = 0 : i64, tpu.core_type = #tpu.core_type<tc>, window_params = [{transform_indices = @transform_0, window_bounds = array<i64: 4, 288, 25>}, {pipeline_mode = #tpu.pipeline_mode<synchronous>, transform_indices = @transform_1, window_bounds = array<i64: 25, 10>}, {pipeline_mode = #tpu.pipeline_mode<synchronous>, transform_indices = @transform_2, window_bounds = array<i64: 1, 10>}, {transform_indices = @transform_3, window_bounds = array<i64: 288, 10>}]} {
    %c0 = arith.constant 0 : index
    %c0_0 = arith.constant 0 : index
    %c0_1 = arith.constant 0 : index
    %0 = vector.load %arg1[%c0, %c0_0, %c0_1] : memref<4x288x25xbf16, #tpu.memory_space<vmem>>, vector<1x288x25xbf16>
    %1 = vector.shape_cast %0 : vector<1x288x25xbf16> to vector<288x25xbf16>
    %c1 = arith.constant 1 : index
    %c0_2 = arith.constant 0 : index
    %c0_3 = arith.constant 0 : index
    %2 = vector.load %arg1[%c1, %c0_2, %c0_3] : memref<4x288x25xbf16, #tpu.memory_space<vmem>>, vector<1x288x25xbf16>
    %3 = vector.shape_cast %2 : vector<1x288x25xbf16> to vector<288x25xbf16>
    %c2 = arith.constant 2 : index
    %c0_4 = arith.constant 0 : index
    %c0_5 = arith.constant 0 : index
    %4 = vector.load %arg1[%c2, %c0_4, %c0_5] : memref<4x288x25xbf16, #tpu.memory_space<vmem>>, vector<1x288x25xbf16>
    %5 = vector.shape_cast %4 : vector<1x288x25xbf16> to vector<288x25xbf16>
    %c3 = arith.constant 3 : index
    %c0_6 = arith.constant 0 : index
    %c0_7 = arith.constant 0 : index
    %6 = vector.load %arg1[%c3, %c0_6, %c0_7] : memref<4x288x25xbf16, #tpu.memory_space<vmem>>, vector<1x288x25xbf16>
    %7 = vector.shape_cast %6 : vector<1x288x25xbf16> to vector<288x25xbf16>
    %8 = tpu.concatenate %1, %3, %5, %7 in 0 : vector<288x25xbf16>, vector<288x25xbf16>, vector<288x25xbf16>, vector<288x25xbf16> -> vector<1152x25xbf16>
    %c0_8 = arith.constant 0 : index
    %c0_9 = arith.constant 0 : index
    %9 = vector.load %arg2[%c0_8, %c0_9] : memref<25x10xbf16, #tpu.memory_space<vmem>>, vector<25x10xbf16>
    %cst = arith.constant dense<0.000000e+00> : vector<1152x10xf32>
    %10 = tpu.matmul %8, %9, %cst {dimension_numbers = #tpu.dot_dimension_numbers<[1], [0], [0], [1], [0, 0, 1, 1], [], []>} : vector<1152x25xbf16>, vector<25x10xbf16>, vector<1152x10xf32> -> vector<1152x10xf32>
    %11 = vector.extract_strided_slice %10 {offsets = [0, 0], sizes = [288, 10], strides = [1, 1]} : vector<1152x10xf32> to vector<288x10xf32>
    %12 = vector.extract_strided_slice %10 {offsets = [288, 0], sizes = [288, 10], strides = [1, 1]} : vector<1152x10xf32> to vector<288x10xf32>
    %13 = arith.maximumf %11, %12 : vector<288x10xf32>
    %14 = vector.extract_strided_slice %10 {offsets = [576, 0], sizes = [288, 10], strides = [1, 1]} : vector<1152x10xf32> to vector<288x10xf32>
    %15 = arith.maximumf %13, %14 : vector<288x10xf32>
    %16 = vector.extract_strided_slice %10 {offsets = [864, 0], sizes = [288, 10], strides = [1, 1]} : vector<1152x10xf32> to vector<288x10xf32>
    %17 = arith.maximumf %15, %16 : vector<288x10xf32>
    %c0_10 = arith.constant 0 : index
    %c0_11 = arith.constant 0 : index
    %18 = vector.load %arg3[%c0_10, %c0_11] : memref<1x10xf32, #tpu.memory_space<vmem>>, vector<1x10xf32>
    %19 = vector.broadcast %18 : vector<1x10xf32> to vector<288x10xf32>
    %20 = arith.addf %17, %19 : vector<288x10xf32>
    %cst_12 = arith.constant 0.000000e+00 : f32
    %21 = vector.broadcast %cst_12 : f32 to vector<288x10xf32>
    %22 = arith.maximumf %20, %21 : vector<288x10xf32>
    %23 = arith.truncf %22 : vector<288x10xf32> to vector<288x10xbf16>
    %c0_13 = arith.constant 0 : index
    %c0_14 = arith.constant 0 : index
    %24 = vector.load %arg4[%c0_13, %c0_14] : memref<288x10xbf16, #tpu.memory_space<vmem>>, vector<288x10xbf16>
    tpu.vector_store %arg4[%c0_13, %c0_14], %23 {strides = array<i32>} : memref<288x10xbf16, #tpu.memory_space<vmem>>, vector<288x10xbf16>,
    return
  }
  func.func @transform_0(%arg0: i32) -> (i32, i32, i32) {
    %c0_i32 = arith.constant 0 : i32
    %c0_i32_0 = arith.constant 0 : i32
    %c0_i32_1 = arith.constant 0 : i32
    return %c0_i32, %arg0, %c0_i32_0 : i32, i32, i32
  }
  func.func @transform_1(%arg0: i32) -> (i32, i32) {
    %c0_i32 = arith.constant 0 : i32
    %c0_i32_0 = arith.constant 0 : i32
    %c0_i32_1 = arith.constant 0 : i32
    return %c0_i32, %c0_i32_0 : i32, i32
  }
  func.func @transform_2(%arg0: i32) -> (i32, i32) {
    %c0_i32 = arith.constant 0 : i32
    %c0_i32_0 = arith.constant 0 : i32
    %c0_i32_1 = arith.constant 0 : i32
    return %c0_i32, %c0_i32_0 : i32, i32
  }
  func.func @transform_3(%arg0: i32) -> (i32, i32) {
    %c0_i32 = arith.constant 0 : i32
    %c0_i32_0 = arith.constant 0 : i32
    return %arg0, %c0_i32 : i32, i32
  }
}

module attributes {stable_mosaic.version = 11 : i64} {
  func.func @_conv_pool_relu_kernel(%arg0: i32, %arg1: memref<4x32x250xbf16, #tpu.memory_space<vmem>>, %arg2: memref<250x20xbf16, #tpu.memory_space<vmem>>, %arg3: memref<1x20xf32, #tpu.memory_space<vmem>>, %arg4: memref<32x20xbf16, #tpu.memory_space<vmem>>) attributes {dimension_semantics = [#tpu.dimension_semantics<parallel>], iteration_bounds = array<i64: 1>, scalar_prefetch = 0 : i64, scratch_operands = 0 : i64, tpu.core_type = #tpu.core_type<tc>, window_params = [{transform_indices = @transform_0, window_bounds = array<i64: 4, 32, 250>}, {pipeline_mode = #tpu.pipeline_mode<synchronous>, transform_indices = @transform_1, window_bounds = array<i64: 250, 20>}, {pipeline_mode = #tpu.pipeline_mode<synchronous>, transform_indices = @transform_2, window_bounds = array<i64: 1, 20>}, {transform_indices = @transform_3, window_bounds = array<i64: 32, 20>}]} {
    %c0 = arith.constant 0 : index
    %c0_0 = arith.constant 0 : index
    %c0_1 = arith.constant 0 : index
    %0 = vector.load %arg1[%c0, %c0_0, %c0_1] : memref<4x32x250xbf16, #tpu.memory_space<vmem>>, vector<1x32x250xbf16>
    %1 = vector.shape_cast %0 : vector<1x32x250xbf16> to vector<32x250xbf16>
    %c1 = arith.constant 1 : index
    %c0_2 = arith.constant 0 : index
    %c0_3 = arith.constant 0 : index
    %2 = vector.load %arg1[%c1, %c0_2, %c0_3] : memref<4x32x250xbf16, #tpu.memory_space<vmem>>, vector<1x32x250xbf16>
    %3 = vector.shape_cast %2 : vector<1x32x250xbf16> to vector<32x250xbf16>
    %c2 = arith.constant 2 : index
    %c0_4 = arith.constant 0 : index
    %c0_5 = arith.constant 0 : index
    %4 = vector.load %arg1[%c2, %c0_4, %c0_5] : memref<4x32x250xbf16, #tpu.memory_space<vmem>>, vector<1x32x250xbf16>
    %5 = vector.shape_cast %4 : vector<1x32x250xbf16> to vector<32x250xbf16>
    %c3 = arith.constant 3 : index
    %c0_6 = arith.constant 0 : index
    %c0_7 = arith.constant 0 : index
    %6 = vector.load %arg1[%c3, %c0_6, %c0_7] : memref<4x32x250xbf16, #tpu.memory_space<vmem>>, vector<1x32x250xbf16>
    %7 = vector.shape_cast %6 : vector<1x32x250xbf16> to vector<32x250xbf16>
    %8 = tpu.concatenate %1, %3, %5, %7 in 0 : vector<32x250xbf16>, vector<32x250xbf16>, vector<32x250xbf16>, vector<32x250xbf16> -> vector<128x250xbf16>
    %c0_8 = arith.constant 0 : index
    %c0_9 = arith.constant 0 : index
    %9 = vector.load %arg2[%c0_8, %c0_9] : memref<250x20xbf16, #tpu.memory_space<vmem>>, vector<250x20xbf16>
    %cst = arith.constant dense<0.000000e+00> : vector<128x20xf32>
    %10 = tpu.matmul %8, %9, %cst {dimension_numbers = #tpu.dot_dimension_numbers<[1], [0], [0], [1], [0, 0, 1, 1], [], []>} : vector<128x250xbf16>, vector<250x20xbf16>, vector<128x20xf32> -> vector<128x20xf32>
    %11 = vector.extract_strided_slice %10 {offsets = [0, 0], sizes = [32, 20], strides = [1, 1]} : vector<128x20xf32> to vector<32x20xf32>
    %12 = vector.extract_strided_slice %10 {offsets = [32, 0], sizes = [32, 20], strides = [1, 1]} : vector<128x20xf32> to vector<32x20xf32>
    %13 = arith.maximumf %11, %12 : vector<32x20xf32>
    %14 = vector.extract_strided_slice %10 {offsets = [64, 0], sizes = [32, 20], strides = [1, 1]} : vector<128x20xf32> to vector<32x20xf32>
    %15 = arith.maximumf %13, %14 : vector<32x20xf32>
    %16 = vector.extract_strided_slice %10 {offsets = [96, 0], sizes = [32, 20], strides = [1, 1]} : vector<128x20xf32> to vector<32x20xf32>
    %17 = arith.maximumf %15, %16 : vector<32x20xf32>
    %c0_10 = arith.constant 0 : index
    %c0_11 = arith.constant 0 : index
    %18 = vector.load %arg3[%c0_10, %c0_11] : memref<1x20xf32, #tpu.memory_space<vmem>>, vector<1x20xf32>
    %19 = vector.broadcast %18 : vector<1x20xf32> to vector<32x20xf32>
    %20 = arith.addf %17, %19 : vector<32x20xf32>
    %cst_12 = arith.constant 0.000000e+00 : f32
    %21 = vector.broadcast %cst_12 : f32 to vector<32x20xf32>
    %22 = arith.maximumf %20, %21 : vector<32x20xf32>
    %23 = arith.truncf %22 : vector<32x20xf32> to vector<32x20xbf16>
    %c0_13 = arith.constant 0 : index
    %c0_14 = arith.constant 0 : index
    %24 = vector.load %arg4[%c0_13, %c0_14] : memref<32x20xbf16, #tpu.memory_space<vmem>>, vector<32x20xbf16>
    tpu.vector_store %arg4[%c0_13, %c0_14], %23 {strides = array<i32>} : memref<32x20xbf16, #tpu.memory_space<vmem>>, vector<32x20xbf16>,
    return
  }
  func.func @transform_0(%arg0: i32) -> (i32, i32, i32) {
    %c0_i32 = arith.constant 0 : i32
    %c0_i32_0 = arith.constant 0 : i32
    %c0_i32_1 = arith.constant 0 : i32
    return %c0_i32, %arg0, %c0_i32_0 : i32, i32, i32
  }
  func.func @transform_1(%arg0: i32) -> (i32, i32) {
    %c0_i32 = arith.constant 0 : i32
    %c0_i32_0 = arith.constant 0 : i32
    %c0_i32_1 = arith.constant 0 : i32
    return %c0_i32, %c0_i32_0 : i32, i32
  }
  func.func @transform_2(%arg0: i32) -> (i32, i32) {
    %c0_i32 = arith.constant 0 : i32
    %c0_i32_0 = arith.constant 0 : i32
    %c0_i32_1 = arith.constant 0 : i32
    return %c0_i32, %c0_i32_0 : i32, i32
  }
  func.func @transform_3(%arg0: i32) -> (i32, i32) {
    %c0_i32 = arith.constant 0 : i32
    %c0_i32_0 = arith.constant 0 : i32
    return %arg0, %c0_i32 : i32, i32
  }
}

module attributes {stable_mosaic.version = 11 : i64} {
  func.func @_mlp_logsoftmax_kernel(%arg0: i32, %arg1: memref<8x320xbf16, #tpu.memory_space<vmem>>, %arg2: memref<320x50xbf16, #tpu.memory_space<vmem>>, %arg3: memref<1x50xf32, #tpu.memory_space<vmem>>, %arg4: memref<50x10xbf16, #tpu.memory_space<vmem>>, %arg5: memref<1x10xf32, #tpu.memory_space<vmem>>, %arg6: memref<8x10xf32, #tpu.memory_space<vmem>>) attributes {dimension_semantics = [#tpu.dimension_semantics<parallel>], iteration_bounds = array<i64: 1>, scalar_prefetch = 0 : i64, scratch_operands = 0 : i64, tpu.core_type = #tpu.core_type<tc>, window_params = [{transform_indices = @transform_0, window_bounds = array<i64: 8, 320>}, {pipeline_mode = #tpu.pipeline_mode<synchronous>, transform_indices = @transform_1, window_bounds = array<i64: 320, 50>}, {pipeline_mode = #tpu.pipeline_mode<synchronous>, transform_indices = @transform_2, window_bounds = array<i64: 1, 50>}, {pipeline_mode = #tpu.pipeline_mode<synchronous>, transform_indices = @transform_3, window_bounds = array<i64: 50, 10>}, {pipeline_mode = #tpu.pipeline_mode<synchronous>, transform_indices = @transform_4, window_bounds = array<i64: 1, 10>}, {transform_indices = @transform_5, window_bounds = array<i64: 8, 10>}]} {
    %c0 = arith.constant 0 : index
    %c0_0 = arith.constant 0 : index
    %0 = vector.load %arg1[%c0, %c0_0] : memref<8x320xbf16, #tpu.memory_space<vmem>>, vector<8x320xbf16>
    %c0_1 = arith.constant 0 : index
    %c0_2 = arith.constant 0 : index
    %1 = vector.load %arg2[%c0_1, %c0_2] : memref<320x50xbf16, #tpu.memory_space<vmem>>, vector<320x50xbf16>
    %cst = arith.constant dense<0.000000e+00> : vector<8x50xf32>
    %2 = tpu.matmul %0, %1, %cst {dimension_numbers = #tpu.dot_dimension_numbers<[1], [0], [0], [1], [0, 0, 1, 1], [], []>} : vector<8x320xbf16>, vector<320x50xbf16>, vector<8x50xf32> -> vector<8x50xf32>
    %c0_3 = arith.constant 0 : index
    %c0_4 = arith.constant 0 : index
    %3 = vector.load %arg3[%c0_3, %c0_4] : memref<1x50xf32, #tpu.memory_space<vmem>>, vector<1x50xf32>
    %4 = vector.broadcast %3 : vector<1x50xf32> to vector<8x50xf32>
    %5 = arith.addf %2, %4 : vector<8x50xf32>
    %cst_5 = arith.constant 0.000000e+00 : f32
    %6 = vector.broadcast %cst_5 : f32 to vector<8x50xf32>
    %7 = arith.maximumf %5, %6 : vector<8x50xf32>
    %8 = arith.truncf %7 : vector<8x50xf32> to vector<8x50xbf16>
    %c0_6 = arith.constant 0 : index
    %c0_7 = arith.constant 0 : index
    %9 = vector.load %arg4[%c0_6, %c0_7] : memref<50x10xbf16, #tpu.memory_space<vmem>>, vector<50x10xbf16>
    %cst_8 = arith.constant dense<0.000000e+00> : vector<8x10xf32>
    %10 = tpu.matmul %8, %9, %cst_8 {dimension_numbers = #tpu.dot_dimension_numbers<[1], [0], [0], [1], [0, 0, 1, 1], [], []>} : vector<8x50xbf16>, vector<50x10xbf16>, vector<8x10xf32> -> vector<8x10xf32>
    %c0_9 = arith.constant 0 : index
    %c0_10 = arith.constant 0 : index
    %11 = vector.load %arg5[%c0_9, %c0_10] : memref<1x10xf32, #tpu.memory_space<vmem>>, vector<1x10xf32>
    %12 = vector.broadcast %11 : vector<1x10xf32> to vector<8x10xf32>
    %13 = arith.addf %10, %12 : vector<8x10xf32>
    %cst_11 = arith.constant dense<0xFF800000> : vector<8xf32>
    %14 = vector.multi_reduction <maximumf>, %13, %cst_11 [1] : vector<8x10xf32> to vector<8xf32>
    %15 = vector.shape_cast %14 : vector<8xf32> to vector<8x1xf32>
    %16 = vector.broadcast %15 : vector<8x1xf32> to vector<8x10xf32>
    %17 = arith.subf %13, %16 : vector<8x10xf32>
    %18 = math.exp %17 : vector<8x10xf32>
    %cst_12 = arith.constant dense<0.000000e+00> : vector<8xf32>
    %19 = vector.multi_reduction <add>, %18, %cst_12 [1] : vector<8x10xf32> to vector<8xf32>
    %20 = vector.shape_cast %19 : vector<8xf32> to vector<8x1xf32>
    %21 = math.log %20 : vector<8x1xf32>
    %22 = arith.addf %15, %21 : vector<8x1xf32>
    %23 = vector.broadcast %22 : vector<8x1xf32> to vector<8x10xf32>
    %24 = arith.subf %13, %23 : vector<8x10xf32>
    %c0_13 = arith.constant 0 : index
    %c0_14 = arith.constant 0 : index
    %25 = vector.load %arg6[%c0_13, %c0_14] : memref<8x10xf32, #tpu.memory_space<vmem>>, vector<8x10xf32>
    tpu.vector_store %arg6[%c0_13, %c0_14], %24 {strides = array<i32>} : memref<8x10xf32, #tpu.memory_space<vmem>>, vector<8x10xf32>,
    return
  }
  func.func @transform_0(%arg0: i32) -> (i32, i32) {
    %c0_i32 = arith.constant 0 : i32
    %c0_i32_0 = arith.constant 0 : i32
    return %arg0, %c0_i32 : i32, i32
  }
  func.func @transform_1(%arg0: i32) -> (i32, i32) {
    %c0_i32 = arith.constant 0 : i32
    %c0_i32_0 = arith.constant 0 : i32
    %c0_i32_1 = arith.constant 0 : i32
    return %c0_i32, %c0_i32_0 : i32, i32
  }
  func.func @transform_2(%arg0: i32) -> (i32, i32) {
    %c0_i32 = arith.constant 0 : i32
    %c0_i32_0 = arith.constant 0 : i32
    %c0_i32_1 = arith.constant 0 : i32
    return %c0_i32, %c0_i32_0 : i32, i32
  }
  func.func @transform_3(%arg0: i32) -> (i32, i32) {
    %c0_i32 = arith.constant 0 : i32
    %c0_i32_0 = arith.constant 0 : i32
    %c0_i32_1 = arith.constant 0 : i32
    return %c0_i32, %c0_i32_0 : i32, i32
  }
  func.func @transform_4(%arg0: i32) -> (i32, i32) {
    %c0_i32 = arith.constant 0 : i32
    %c0_i32_0 = arith.constant 0 : i32
    %c0_i32_1 = arith.constant 0 : i32
    return %c0_i32, %c0_i32_0 : i32, i32
  }
  func.func @transform_5(%arg0: i32) -> (i32, i32) {
    %c0_i32 = arith.constant 0 : i32
    %c0_i32_0 = arith.constant 0 : i32
    return %arg0, %c0_i32 : i32, i32
  }
}

</mosaic_0001>

<bundles_post_ra>
// kernel: net_forward.3
= control target key start
LH: loop header
LB: loop body
LE: loop exit
PB: predicated region body
PF: predicated region fallthrough
CT: control target
= control target key end

     0   :  { %vm754_vm0 = vcmask 1043456   ;;  %vm755_vm1 = vcmask 1044480   ;;  %v1949_v2 = vmov 65535   ;;  %vm537_vm2 = vcmask 203776   ;;  %s2452_s1 = inlined_call_operand.vmem [shape: bf16[25,10], index: 1, kind: input, shape index: {}]   ;;  %s2453_s0 = inlined_call_operand.vmem [shape: bf16[4,288,25], index: 0, kind: input, shape index: {}]   ;;  %s2454_s2 = inlined_call_operand.vmem [shape: f32[1,10], index: 2, kind: input, shape index: {}]   ;;  %s2455_s3 = inlined_call_operand.vmem [shape: bf16[288,10], index: 3, kind: output, shape index: {}]  }
   0x1   :  { %v1793_v0 = vld [vmem:[%s2452_s1 + $0x8] sm:$0xf]  ;;  %v1940_v1 = vld [vmem:[%s2452_s1 + $0x8] sm:$0x10]  ;;  %v756_v3 = vsel %vm754_vm0, 4294967295, %v1949_v2  ;;  %v1939_v7 = vld [vmem:[%s2452_s1] sm:$0xff] }
   0x2   :  { %v1794_v4 = vor.u32 %v1940_v1, %v1793_v0  ;;  %v757_v5 = vsel %vm755_vm1, %v756_v3, 0  ;;  %v1867_v8 = vld [vmem:[%s2453_s0] sm:$0xff]  ;;  %v1885_v9 = vld [vmem:[%s2453_s0 + $0x90] sm:$0xff]  ;;  %v1868_v12 = vld [vmem:[%s2453_s0 + $0x8] sm:$0xff]  ;;  %vm1350_vm3 = vcmask 76800  }
   0x3   :  { %v1903_v10 = vld [vmem:[%s2453_s0 + $0x120] sm:$0xff]  ;;  %v1921_v11 = vld [vmem:[%s2453_s0 + $0x1b0] sm:$0xff]  ;;  %v1886_v13 = vld [vmem:[%s2453_s0 + $0x98] sm:$0xff] }
   0x4   :  { %v759_v6 = vand.u32 %v1794_v4, %v757_v5  ;;  %v1904_v14 = vld [vmem:[%s2453_s0 + $0x128] sm:$0xff]  ;;  %v1922_v15 = vld [vmem:[%s2453_s0 + $0x1b8] sm:$0xff]  ;;  %v1869_v16 = vld [vmem:[%s2453_s0 + $0x10] sm:$0xff] }
   0x5   :  { %v1887_v17 = vld [vmem:[%s2453_s0 + $0xa0] sm:$0xff]  ;;  %v1905_v18 = vld [vmem:[%s2453_s0 + $0x130] sm:$0xff]  ;;  %v1870_v20 = vld [vmem:[%s2453_s0 + $0x18] sm:$0xff] }
   0x6   :  { %767 = vmatpush.bf16.msra.mxu0 %v759_v6  ;;  %1941 = vmatpush.bf16.msra.mxu1 %v759_v6  ;;  %v1923_v19 = vld [vmem:[%s2453_s0 + $0x1c0] sm:$0xff]  ;;  %v1888_v21 = vld [vmem:[%s2453_s0 + $0xa8] sm:$0xff]  ;;  %v1906_v22 = vld [vmem:[%s2453_s0 + $0x138] sm:$0xff] }
   0x7   :  { %1942 = vmatpush.bf16.msra.mxu2 %v759_v6  ;;  %1943 = vmatpush.bf16.msra.mxu3 %v759_v6  ;;  %v1924_v23 = vld [vmem:[%s2453_s0 + $0x1c8] sm:$0xff]  ;;  %v1871_v24 = vld [vmem:[%s2453_s0 + $0x20] sm:$0xff]  ;;  %v1889_v25 = vld [vmem:[%s2453_s0 + $0xb0] sm:$0xff] }
   0x8   :  { %v1907_v26 = vld [vmem:[%s2453_s0 + $0x140] sm:$0xff]  ;;  %v1925_v27 = vld [vmem:[%s2453_s0 + $0x1d0] sm:$0xff]  ;;  %v1872_v28 = vld [vmem:[%s2453_s0 + $0x28] sm:$0xff] }
   0x9   :  { %v1890_v29 = vld [vmem:[%s2453_s0 + $0xb8] sm:$0xff]  ;;  %v1908_v30 = vld [vmem:[%s2453_s0 + $0x148] sm:$0xff]  ;;  %v1873_v32 = vld [vmem:[%s2453_s0 + $0x30] sm:$0xff] }
   0xa   :  { %768 = vmatpush.bf16.msra.mxu0 %v1939_v7  ;;  %1944 = vmatpush.bf16.msra.mxu1 %v1939_v7  ;;  %v1926_v31 = vld [vmem:[%s2453_s0 + $0x1d8] sm:$0xff]  ;;  %v1891_v33 = vld [vmem:[%s2453_s0 + $0xc0] sm:$0xff]  ;;  %v1909_v34 = vld [vmem:[%s2453_s0 + $0x150] sm:$0xff] }
   0xb   :  { %1945 = vmatpush.bf16.msra.mxu2 %v1939_v7  ;;  %1946 = vmatpush.bf16.msra.mxu3 %v1939_v7  ;;  %v1927_v35 = vld [vmem:[%s2453_s0 + $0x1e0] sm:$0xff]  ;;  %v1874_v36 = vld [vmem:[%s2453_s0 + $0x38] sm:$0xff]  ;;  %v1892_v37 = vld [vmem:[%s2453_s0 + $0xc8] sm:$0xff] }
   0xc   :  { %v1910_v38 = vld [vmem:[%s2453_s0 + $0x158] sm:$0xff]  ;;  %v1928_v39 = vld [vmem:[%s2453_s0 + $0x1e8] sm:$0xff]  ;;  %v1875_v40 = vld [vmem:[%s2453_s0 + $0x40] sm:$0xff] }
   0xd   :  { %1795 = vmatmul.msk.bf16.vlgmr.msra.gmra.mxu0 %vm537_vm2, %v1867_v8  ;;  %1813 = vmatmul.msk.bf16.vlgmr.msra.gmra.mxu1 %vm537_vm2, %v1885_v9  ;;  %v1893_v41 = vld [vmem:[%s2453_s0 + $0xd0] sm:$0xff]  ;;  %v1911_v44 = vld [vmem:[%s2453_s0 + $0x160] sm:$0xff]  ;;  %v1876_v59 = vld [vmem:[%s2453_s0 + $0x48] sm:$0xff] }
   0xe   :  { %1831 = vmatmul.msk.bf16.vlgmr.msra.gmra.mxu2 %vm537_vm2, %v1903_v10  ;;  %1849 = vmatmul.msk.bf16.vlgmr.msra.gmra.mxu3 %vm537_vm2, %v1921_v11  ;;  %v1929_v45 = vld [vmem:[%s2453_s0 + $0x1f0] sm:$0xff]  ;;  %v2126_v50 = vld [vmem:[%s2454_s2] ss:$0 sm:$0xff]  ;;  %v1894_v60 = vld [vmem:[%s2453_s0 + $0xd8] sm:$0xff] }
   0xf   :  { %v1912_v1 = vld [vmem:[%s2453_s0 + $0x168] sm:$0xff]  ;;  %v1930_v2 = vld [vmem:[%s2453_s0 + $0x1f8] sm:$0xff] }
  0x1d   :  { %1796 = vmatmul.msk.bf16.gmra.mxu0 %vm537_vm2, %v1868_v12  ;;  %1814 = vmatmul.msk.bf16.gmra.mxu1 %vm537_vm2, %v1886_v13 }
  0x1e   :  { %1832 = vmatmul.msk.bf16.gmra.mxu2 %vm537_vm2, %v1904_v14  ;;  %1850 = vmatmul.msk.bf16.gmra.mxu3 %vm537_vm2, %v1922_v15 }
  0x2d   :  { %1797 = vmatmul.msk.bf16.gmra.mxu0 %vm537_vm2, %v1869_v16  ;;  %1815 = vmatmul.msk.bf16.gmra.mxu1 %vm537_vm2, %v1887_v17 }
  0x2e   :  { %1833 = vmatmul.msk.bf16.gmra.mxu2 %vm537_vm2, %v1905_v18  ;;  %1851 = vmatmul.msk.bf16.gmra.mxu3 %vm537_vm2, %v1923_v19  ;;  %v1877_v19 = vld [vmem:[%s2453_s0 + $0x50] sm:$0xff] }
  0x3d   :  { %1798 = vmatmul.msk.bf16.gmra.mxu0 %vm537_vm2, %v1870_v20  ;;  %1816 = vmatmul.msk.bf16.gmra.mxu1 %vm537_vm2, %v1888_v21  ;;  %v1895_v20 = vld [vmem:[%s2453_s0 + $0xe0] sm:$0xff] }
  0x3e   :  { %1834 = vmatmul.msk.bf16.gmra.mxu2 %vm537_vm2, %v1906_v22  ;;  %1852 = vmatmul.msk.bf16.gmra.mxu3 %vm537_vm2, %v1924_v23 }
  0x4d   :  { %1799 = vmatmul.msk.bf16.gmra.mxu0 %vm537_vm2, %v1871_v24  ;;  %1817 = vmatmul.msk.bf16.gmra.mxu1 %vm537_vm2, %v1889_v25  ;;  %v1913_v25 = vld [vmem:[%s2453_s0 + $0x170] sm:$0xff] }
  0x4e   :  { %1835 = vmatmul.msk.bf16.gmra.mxu2 %vm537_vm2, %v1907_v26  ;;  %1853 = vmatmul.msk.bf16.gmra.mxu3 %vm537_vm2, %v1925_v27  ;;  %v1931_v26 = vld [vmem:[%s2453_s0 + $0x200] sm:$0xff] }
  0x5d   :  { %1800 = vmatmul.msk.bf16.gmra.mxu0 %vm537_vm2, %v1872_v28  ;;  %1818 = vmatmul.msk.bf16.gmra.mxu1 %vm537_vm2, %v1890_v29 }
  0x5e   :  { %1836 = vmatmul.msk.bf16.gmra.mxu2 %vm537_vm2, %v1908_v30  ;;  %1854 = vmatmul.msk.bf16.gmra.mxu3 %vm537_vm2, %v1926_v31 }
  0x6d   :  { %1801 = vmatmul.msk.bf16.gmra.mxu0 %vm537_vm2, %v1873_v32  ;;  %1819 = vmatmul.msk.bf16.gmra.mxu1 %vm537_vm2, %v1891_v33 }
  0x6e   :  { %1837 = vmatmul.msk.bf16.gmra.mxu2 %vm537_vm2, %v1909_v34  ;;  %1855 = vmatmul.msk.bf16.gmra.mxu3 %vm537_vm2, %v1927_v35 }
  0x7d   :  { %1802 = vmatmul.msk.bf16.gmra.mxu0 %vm537_vm2, %v1874_v36  ;;  %1820 = vmatmul.msk.bf16.gmra.mxu1 %vm537_vm2, %v1892_v37 }
  0x7e   :  { %1838 = vmatmul.msk.bf16.gmra.mxu2 %vm537_vm2, %v1910_v38  ;;  %1856 = vmatmul.msk.bf16.gmra.mxu3 %vm537_vm2, %v1928_v39 }
  0x8a   :  { %v770_v42 = vpop.f32.mrf.mxu0  ;;  %v860_v43 = vpop.f32.mrf.mxu1 }
  0x8b   :  { %v1130_v46 = vmax.f32 %v770_v42, %v860_v43  ;;  %v1878_v43 = vld [vmem:[%s2453_s0 + $0x58] sm:$0xff] }
  0x8d   :  { %1803 = vmatmul.msk.bf16.gmra.mxu0 %vm537_vm2, %v1875_v40  ;;  %1821 = vmatmul.msk.bf16.gmra.mxu1 %vm537_vm2, %v1893_v41 }
  0x8e   :  { %1839 = vmatmul.msk.bf16.gmra.mxu2 %vm537_vm2, %v1911_v44  ;;  %1857 = vmatmul.msk.bf16.gmra.mxu3 %vm537_vm2, %v1929_v45  ;;  %v1896_v44 = vld [vmem:[%s2453_s0 + $0xe8] sm:$0xff] }
  0x91   :  { %v950_v47 = vpop.f32.mrf.mxu2  ;;  %v1040_v48 = vpop.f32.mrf.mxu3 }
  0x92   :  { %v1166_v49 = vmax.f32 %v1130_v46, %v950_v47  ;;  %v772_v51 = vpop.f32.mrf.mxu0  ;;  %v862_v52 = vpop.f32.mrf.mxu1 }
  0x93   :  { %v1131_v56 = vmax.f32 %v772_v51, %v862_v52  ;;  %v1932_v51 = vld [vmem:[%s2453_s0 + $0x208] sm:$0xff] }
  0x94   :  { %v1202_v53 = vmax.f32 %v1166_v49, %v1040_v48  ;;  %v1914_v49 = vld [vmem:[%s2453_s0 + $0x178] sm:$0xff] }
  0x96   :  { %v1242_v54 = vadd.f32 %v2126_v50, %v1202_v53 }
  0x98   :  { %v1278_v55 = vmax.f32 %v1242_v54, 0.0 }
  0x99   :  { %v952_v57 = vpop.f32.mrf.mxu2  ;;  %v1042_v58 = vpop.f32.mrf.mxu3 }
  0x9a   :  { %v1314_v61 = vpack.c.bf16 %v1278_v55, %v1278_v55  ;;  %v1167_v62 = vmax.f32 %v1131_v56, %v952_v57  ;;  %v775_v63 = vpop.f32.mrf.mxu0  ;;  %v865_v0 = vpop.f32.mrf.mxu1 }
  0x9b   :  { %v1132_v5 = vmax.f32 %v775_v63, %v865_v0 }
  0x9c   :  { %1351 = vst.msk [vmem:[%s2455_s3] sm:$0xf] %vm1350_vm3, %v1314_v61  ;;  %v1203_v3 = vmax.f32 %v1167_v62, %v1042_v58 }
  0x9d   :  { %1804 = vmatmul.msk.bf16.gmra.mxu0 %vm537_vm2, %v1876_v59  ;;  %1822 = vmatmul.msk.bf16.gmra.mxu1 %vm537_vm2, %v1894_v60 }
  0x9e   :  { %v1243_v4 = vadd.f32 %v2126_v50, %v1203_v3  ;;  %1840 = vmatmul.msk.bf16.gmra.mxu2 %vm537_vm2, %v1912_v1  ;;  %1858 = vmatmul.msk.bf16.gmra.mxu3 %vm537_vm2, %v1930_v2 }
  0xa0   :  { %v1279_v6 = vmax.f32 %v1243_v4, 0.0  ;;  %v1879_v4 = vld [vmem:[%s2453_s0 + $0x60] sm:$0xff] }
  0xa1   :  { %v955_v7 = vpop.f32.mrf.mxu2  ;;  %v1045_v8 = vpop.f32.mrf.mxu3 }
  0xa2   :  { %v1315_v9 = vpack.c.bf16 %v1279_v6, %v1279_v6  ;;  %v1168_v10 = vmax.f32 %v1132_v5, %v955_v7  ;;  %v777_v11 = vpop.f32.mrf.mxu0  ;;  %v867_v12 = vpop.f32.mrf.mxu1  ;;  %v1897_v5 = vld [vmem:[%s2453_s0 + $0xf0] sm:$0xff] }
  0xa3   :  { %v1133_v16 = vmax.f32 %v777_v11, %v867_v12  ;;  %v1933_v11 = vld [vmem:[%s2453_s0 + $0x210] sm:$0xff] }
  0xa4   :  { %1352 = vst.msk [vmem:[%s2455_s3 + $0x4] sm:$0xf] %vm1350_vm3, %v1315_v9  ;;  %v1204_v13 = vmax.f32 %v1168_v10, %v1045_v8  ;;  %v1915_v10 = vld [vmem:[%s2453_s0 + $0x180] sm:$0xff] }
  0xa6   :  { %v1244_v14 = vadd.f32 %v2126_v50, %v1204_v13 }
  0xa8   :  { %v1280_v15 = vmax.f32 %v1244_v14, 0.0 }
  0xa9   :  { %v957_v17 = vpop.f32.mrf.mxu2  ;;  %v1047_v18 = vpop.f32.mrf.mxu3 }
  0xaa   :  { %v1316_v21 = vpack.c.bf16 %v1280_v15, %v1280_v15  ;;  %v1169_v22 = vmax.f32 %v1133_v16, %v957_v17  ;;  %v780_v23 = vpop.f32.mrf.mxu0  ;;  %v870_v24 = vpop.f32.mrf.mxu1 }
  0xab   :  { %v1134_v29 = vmax.f32 %v780_v23, %v870_v24 }
  0xac   :  { %1353 = vst.msk [vmem:[%s2455_s3 + $0x8] sm:$0xf] %vm1350_vm3, %v1316_v21  ;;  %v1205_v27 = vmax.f32 %v1169_v22, %v1047_v18 }
  0xad   :  { %1805 = vmatmul.msk.bf16.gmra.mxu0 %vm537_vm2, %v1877_v19  ;;  %1823 = vmatmul.msk.bf16.gmra.mxu1 %vm537_vm2, %v1895_v20 }
  0xae   :  { %v1245_v28 = vadd.f32 %v2126_v50, %v1205_v27  ;;  %1841 = vmatmul.msk.bf16.gmra.mxu2 %vm537_vm2, %v1913_v25  ;;  %1859 = vmatmul.msk.bf16.gmra.mxu3 %vm537_vm2, %v1931_v26 }
  0xb0   :  { %v1281_v30 = vmax.f32 %v1245_v28, 0.0  ;;  %v1880_v28 = vld [vmem:[%s2453_s0 + $0x68] sm:$0xff] }
  0xb1   :  { %v960_v31 = vpop.f32.mrf.mxu2  ;;  %v1050_v32 = vpop.f32.mrf.mxu3 }
  0xb2   :  { %v1317_v33 = vpack.c.bf16 %v1281_v30, %v1281_v30  ;;  %v1170_v34 = vmax.f32 %v1134_v29, %v960_v31  ;;  %v782_v35 = vpop.f32.mrf.mxu0  ;;  %v872_v36 = vpop.f32.mrf.mxu1  ;;  %v1898_v29 = vld [vmem:[%s2453_s0 + $0xf8] sm:$0xff] }
  0xb3   :  { %v1135_v40 = vmax.f32 %v782_v35, %v872_v36  ;;  %v1934_v35 = vld [vmem:[%s2453_s0 + $0x218] sm:$0xff] }
  0xb4   :  { %1354 = vst.msk [vmem:[%s2455_s3 + $0xc] sm:$0xf] %vm1350_vm3, %v1317_v33  ;;  %v1206_v37 = vmax.f32 %v1170_v34, %v1050_v32  ;;  %v1916_v34 = vld [vmem:[%s2453_s0 + $0x188] sm:$0xff] }
  0xb6   :  { %v1246_v38 = vadd.f32 %v2126_v50, %v1206_v37 }
  0xb8   :  { %v1282_v39 = vmax.f32 %v1246_v38, 0.0 }
  0xb9   :  { %v962_v41 = vpop.f32.mrf.mxu2  ;;  %v1052_v42 = vpop.f32.mrf.mxu3 }
  0xba   :  { %v1318_v45 = vpack.c.bf16 %v1282_v39, %v1282_v39  ;;  %v1171_v46 = vmax.f32 %v1135_v40, %v962_v41  ;;  %v785_v47 = vpop.f32.mrf.mxu0  ;;  %v875_v48 = vpop.f32.mrf.mxu1 }
  0xbb   :  { %v1136_v54 = vmax.f32 %v785_v47, %v875_v48 }
  0xbc   :  { %1355 = vst.msk [vmem:[%s2455_s3 + $0x10] sm:$0xf] %vm1350_vm3, %v1318_v45  ;;  %v1207_v52 = vmax.f32 %v1171_v46, %v1052_v42 }
  0xbd   :  { %1806 = vmatmul.msk.bf16.gmra.mxu0 %vm537_vm2, %v1878_v43  ;;  %1824 = vmatmul.msk.bf16.gmra.mxu1 %vm537_vm2, %v1896_v44 }
  0xbe   :  { %v1247_v53 = vadd.f32 %v2126_v50, %v1207_v52  ;;  %1842 = vmatmul.msk.bf16.gmra.mxu2 %vm537_vm2, %v1914_v49  ;;  %1860 = vmatmul.msk.bf16.gmra.mxu3 %vm537_vm2, %v1932_v51 }
  0xc0   :  { %v1283_v55 = vmax.f32 %v1247_v53, 0.0  ;;  %v1881_v53 = vld [vmem:[%s2453_s0 + $0x70] sm:$0xff] }
  0xc1   :  { %v965_v56 = vpop.f32.mrf.mxu2  ;;  %v1055_v57 = vpop.f32.mrf.mxu3 }
  0xc2   :  { %v1319_v58 = vpack.c.bf16 %v1283_v55, %v1283_v55  ;;  %v1172_v59 = vmax.f32 %v1136_v54, %v965_v56  ;;  %v787_v60 = vpop.f32.mrf.mxu0  ;;  %v877_v61 = vpop.f32.mrf.mxu1  ;;  %v1899_v54 = vld [vmem:[%s2453_s0 + $0x100] sm:$0xff] }
  0xc3   :  { %v1137_v1 = vmax.f32 %v787_v60, %v877_v61  ;;  %v1935_v60 = vld [vmem:[%s2453_s0 + $0x220] sm:$0xff] }
  0xc4   :  { %1356 = vst.msk [vmem:[%s2455_s3 + $0x14] sm:$0xf] %vm1350_vm3, %v1319_v58  ;;  %v1208_v62 = vmax.f32 %v1172_v59, %v1055_v57  ;;  %v1917_v59 = vld [vmem:[%s2453_s0 + $0x190] sm:$0xff] }
  0xc6   :  { %v1248_v63 = vadd.f32 %v2126_v50, %v1208_v62 }
  0xc8   :  { %v1284_v0 = vmax.f32 %v1248_v63, 0.0 }
  0xc9   :  { %v967_v2 = vpop.f32.mrf.mxu2  ;;  %v1057_v3 = vpop.f32.mrf.mxu3 }
  0xca   :  { %v1320_v6 = vpack.c.bf16 %v1284_v0, %v1284_v0  ;;  %v1173_v7 = vmax.f32 %v1137_v1, %v967_v2  ;;  %v790_v8 = vpop.f32.mrf.mxu0  ;;  %v880_v9 = vpop.f32.mrf.mxu1 }
  0xcb   :  { %v1138_v14 = vmax.f32 %v790_v8, %v880_v9 }
  0xcc   :  { %1357 = vst.msk [vmem:[%s2455_s3 + $0x18] sm:$0xf] %vm1350_vm3, %v1320_v6  ;;  %v1209_v12 = vmax.f32 %v1173_v7, %v1057_v3 }
  0xcd   :  { %1807 = vmatmul.msk.bf16.gmra.mxu0 %vm537_vm2, %v1879_v4  ;;  %1825 = vmatmul.msk.bf16.gmra.mxu1 %vm537_vm2, %v1897_v5 }
  0xce   :  { %v1249_v13 = vadd.f32 %v2126_v50, %v1209_v12  ;;  %1843 = vmatmul.msk.bf16.gmra.mxu2 %vm537_vm2, %v1915_v10  ;;  %1861 = vmatmul.msk.bf16.gmra.mxu3 %vm537_vm2, %v1933_v11 }
  0xd0   :  { %v1285_v15 = vmax.f32 %v1249_v13, 0.0  ;;  %v1882_v13 = vld [vmem:[%s2453_s0 + $0x78] sm:$0xff] }
  0xd1   :  { %v970_v16 = vpop.f32.mrf.mxu2  ;;  %v1060_v17 = vpop.f32.mrf.mxu3 }
  0xd2   :  { %v1321_v18 = vpack.c.bf16 %v1285_v15, %v1285_v15  ;;  %v1174_v19 = vmax.f32 %v1138_v14, %v970_v16  ;;  %v792_v20 = vpop.f32.mrf.mxu0  ;;  %v882_v21 = vpop.f32.mrf.mxu1  ;;  %v1900_v14 = vld [vmem:[%s2453_s0 + $0x108] sm:$0xff] }
  0xd3   :  { %v1139_v25 = vmax.f32 %v792_v20, %v882_v21  ;;  %v1936_v20 = vld [vmem:[%s2453_s0 + $0x228] sm:$0xff] }
  0xd4   :  { %1358 = vst.msk [vmem:[%s2455_s3 + $0x1c] sm:$0xf] %vm1350_vm3, %v1321_v18  ;;  %v1210_v22 = vmax.f32 %v1174_v19, %v1060_v17  ;;  %v1918_v19 = vld [vmem:[%s2453_s0 + $0x198] sm:$0xff] }
  0xd6   :  { %v1250_v23 = vadd.f32 %v2126_v50, %v1210_v22 }
  0xd8   :  { %v1286_v24 = vmax.f32 %v1250_v23, 0.0 }
  0xd9   :  { %v972_v26 = vpop.f32.mrf.mxu2  ;;  %v1062_v27 = vpop.f32.mrf.mxu3 }
  0xda   :  { %v1322_v30 = vpack.c.bf16 %v1286_v24, %v1286_v24  ;;  %v1175_v31 = vmax.f32 %v1139_v25, %v972_v26  ;;  %v795_v32 = vpop.f32.mrf.mxu0  ;;  %v885_v33 = vpop.f32.mrf.mxu1 }
  0xdb   :  { %v1140_v38 = vmax.f32 %v795_v32, %v885_v33 }
  0xdc   :  { %1359 = vst.msk [vmem:[%s2455_s3 + $0x20] sm:$0xf] %vm1350_vm3, %v1322_v30  ;;  %v1211_v36 = vmax.f32 %v1175_v31, %v1062_v27 }
  0xdd   :  { %1808 = vmatmul.msk.bf16.gmra.mxu0 %vm537_vm2, %v1880_v28  ;;  %1826 = vmatmul.msk.bf16.gmra.mxu1 %vm537_vm2, %v1898_v29 }
  0xde   :  { %v1251_v37 = vadd.f32 %v2126_v50, %v1211_v36  ;;  %1844 = vmatmul.msk.bf16.gmra.mxu2 %vm537_vm2, %v1916_v34  ;;  %1862 = vmatmul.msk.bf16.gmra.mxu3 %vm537_vm2, %v1934_v35 }
  0xe0   :  { %v1287_v39 = vmax.f32 %v1251_v37, 0.0  ;;  %v1883_v37 = vld [vmem:[%s2453_s0 + $0x80] sm:$0xff] }
  0xe1   :  { %v975_v40 = vpop.f32.mrf.mxu2  ;;  %v1065_v41 = vpop.f32.mrf.mxu3 }
  0xe2   :  { %v1323_v42 = vpack.c.bf16 %v1287_v39, %v1287_v39  ;;  %v1176_v43 = vmax.f32 %v1140_v38, %v975_v40  ;;  %v797_v44 = vpop.f32.mrf.mxu0  ;;  %v887_v45 = vpop.f32.mrf.mxu1  ;;  %v1901_v38 = vld [vmem:[%s2453_s0 + $0x110] sm:$0xff] }
  0xe3   :  { %v1141_v49 = vmax.f32 %v797_v44, %v887_v45  ;;  %v1937_v44 = vld [vmem:[%s2453_s0 + $0x230] sm:$0xff] }
  0xe4   :  { %1360 = vst.msk [vmem:[%s2455_s3 + $0x24] sm:$0xf] %vm1350_vm3, %v1323_v42  ;;  %v1212_v46 = vmax.f32 %v1176_v43, %v1065_v41  ;;  %v1919_v43 = vld [vmem:[%s2453_s0 + $0x1a0] sm:$0xff] }
  0xe6   :  { %v1252_v47 = vadd.f32 %v2126_v50, %v1212_v46 }
  0xe8   :  { %v1288_v48 = vmax.f32 %v1252_v47, 0.0 }
  0xe9   :  { %v977_v51 = vpop.f32.mrf.mxu2  ;;  %v1067_v52 = vpop.f32.mrf.mxu3 }
  0xea   :  { %v1324_v55 = vpack.c.bf16 %v1288_v48, %v1288_v48  ;;  %v1177_v56 = vmax.f32 %v1141_v49, %v977_v51  ;;  %v800_v57 = vpop.f32.mrf.mxu0  ;;  %v890_v58 = vpop.f32.mrf.mxu1 }
  0xeb   :  { %v1142_v63 = vmax.f32 %v800_v57, %v890_v58 }
  0xec   :  { %1361 = vst.msk [vmem:[%s2455_s3 + $0x28] sm:$0xf] %vm1350_vm3, %v1324_v55  ;;  %v1213_v61 = vmax.f32 %v1177_v56, %v1067_v52 }
  0xed   :  { %1809 = vmatmul.msk.bf16.gmra.mxu0 %vm537_vm2, %v1881_v53  ;;  %1827 = vmatmul.msk.bf16.gmra.mxu1 %vm537_vm2, %v1899_v54 }
  0xee   :  { %v1253_v62 = vadd.f32 %v2126_v50, %v1213_v61  ;;  %1845 = vmatmul.msk.bf16.gmra.mxu2 %vm537_vm2, %v1917_v59  ;;  %1863 = vmatmul.msk.bf16.gmra.mxu3 %vm537_vm2, %v1935_v60 }
  0xf0   :  { %v1289_v0 = vmax.f32 %v1253_v62, 0.0  ;;  %v1884_v62 = vld [vmem:[%s2453_s0 + $0x88] sm:$0xff] }
  0xf1   :  { %v980_v1 = vpop.f32.mrf.mxu2  ;;  %v1070_v2 = vpop.f32.mrf.mxu3 }
  0xf2   :  { %v1325_v3 = vpack.c.bf16 %v1289_v0, %v1289_v0  ;;  %v1178_v4 = vmax.f32 %v1142_v63, %v980_v1  ;;  %v802_v5 = vpop.f32.mrf.mxu0  ;;  %v892_v6 = vpop.f32.mrf.mxu1  ;;  %v1902_v63 = vld [vmem:[%s2453_s0 + $0x118] sm:$0xff] }
  0xf3   :  { %v1143_v10 = vmax.f32 %v802_v5, %v892_v6  ;;  %v1938_v5 = vld [vmem:[%s2453_s0 + $0x238] sm:$0xff] }
  0xf4   :  { %1362 = vst.msk [vmem:[%s2455_s3 + $0x2c] sm:$0xf] %vm1350_vm3, %v1325_v3  ;;  %v1214_v7 = vmax.f32 %v1178_v4, %v1070_v2  ;;  %v1920_v4 = vld [vmem:[%s2453_s0 + $0x1a8] sm:$0xff] }
  0xf6   :  { %v1254_v8 = vadd.f32 %v2126_v50, %v1214_v7 }
  0xf8   :  { %v1290_v9 = vmax.f32 %v1254_v8, 0.0 }
  0xf9   :  { %v982_v11 = vpop.f32.mrf.mxu2  ;;  %v1072_v12 = vpop.f32.mrf.mxu3 }
  0xfa   :  { %v1326_v15 = vpack.c.bf16 %v1290_v9, %v1290_v9  ;;  %v1179_v16 = vmax.f32 %v1143_v10, %v982_v11  ;;  %v805_v17 = vpop.f32.mrf.mxu0  ;;  %v895_v18 = vpop.f32.mrf.mxu1 }
  0xfb   :  { %v1144_v23 = vmax.f32 %v805_v17, %v895_v18 }
  0xfc   :  { %1363 = vst.msk [vmem:[%s2455_s3 + $0x30] sm:$0xf] %vm1350_vm3, %v1326_v15  ;;  %v1215_v21 = vmax.f32 %v1179_v16, %v1072_v12 }
  0xfd   :  { %1810 = vmatmul.msk.bf16.gmra.mxu0 %vm537_vm2, %v1882_v13  ;;  %1828 = vmatmul.msk.bf16.gmra.mxu1 %vm537_vm2, %v1900_v14 }
  0xfe   :  { %v1255_v22 = vadd.f32 %v2126_v50, %v1215_v21  ;;  %1846 = vmatmul.msk.bf16.gmra.mxu2 %vm537_vm2, %v1918_v19  ;;  %1864 = vmatmul.msk.bf16.gmra.mxu3 %vm537_vm2, %v1936_v20 }
 0x100   :  { %v1291_v24 = vmax.f32 %v1255_v22, 0.0 }
 0x101   :  { %v985_v25 = vpop.f32.mrf.mxu2  ;;  %v1075_v26 = vpop.f32.mrf.mxu3 }
 0x102   :  { %v1327_v27 = vpack.c.bf16 %v1291_v24, %v1291_v24  ;;  %v1180_v28 = vmax.f32 %v1144_v23, %v985_v25  ;;  %v807_v29 = vpop.f32.mrf.mxu0  ;;  %v897_v30 = vpop.f32.mrf.mxu1 }
 0x103   :  { %v1145_v34 = vmax.f32 %v807_v29, %v897_v30 }
 0x104   :  { %1364 = vst.msk [vmem:[%s2455_s3 + $0x34] sm:$0xf] %vm1350_vm3, %v1327_v27  ;;  %v1216_v31 = vmax.f32 %v1180_v28, %v1075_v26 }
 0x106   :  { %v1256_v32 = vadd.f32 %v2126_v50, %v1216_v31 }
 0x108   :  { %v1292_v33 = vmax.f32 %v1256_v32, 0.0 }
 0x109   :  { %v987_v35 = vpop.f32.mrf.mxu2  ;;  %v1077_v36 = vpop.f32.mrf.mxu3 }
 0x10a   :  { %v1328_v39 = vpack.c.bf16 %v1292_v33, %v1292_v33  ;;  %v1181_v40 = vmax.f32 %v1145_v34, %v987_v35  ;;  %v810_v41 = vpop.f32.mrf.mxu0  ;;  %v900_v42 = vpop.f32.mrf.mxu1 }
 0x10b   :  { %v1146_v47 = vmax.f32 %v810_v41, %v900_v42 }
 0x10c   :  { %1365 = vst.msk [vmem:[%s2455_s3 + $0x38] sm:$0xf] %vm1350_vm3, %v1328_v39  ;;  %v1217_v45 = vmax.f32 %v1181_v40, %v1077_v36 }
 0x10d   :  { %1811 = vmatmul.msk.bf16.gmra.mxu0 %vm537_vm2, %v1883_v37  ;;  %1829 = vmatmul.msk.bf16.gmra.mxu1 %vm537_vm2, %v1901_v38 }
 0x10e   :  { %v1257_v46 = vadd.f32 %v2126_v50, %v1217_v45  ;;  %1847 = vmatmul.msk.bf16.gmra.mxu2 %vm537_vm2, %v1919_v43  ;;  %1865 = vmatmul.msk.bf16.gmra.mxu3 %vm537_vm2, %v1937_v44 }
 0x110   :  { %v1293_v48 = vmax.f32 %v1257_v46, 0.0 }
 0x111   :  { %v990_v49 = vpop.f32.mrf.mxu2  ;;  %v1080_v51 = vpop.f32.mrf.mxu3 }
 0x112   :  { %v1329_v52 = vpack.c.bf16 %v1293_v48, %v1293_v48  ;;  %v1182_v53 = vmax.f32 %v1146_v47, %v990_v49  ;;  %v812_v54 = vpop.f32.mrf.mxu0  ;;  %v902_v55 = vpop.f32.mrf.mxu1 }
 0x113   :  { %v1147_v59 = vmax.f32 %v812_v54, %v902_v55 }
 0x114   :  { %1366 = vst.msk [vmem:[%s2455_s3 + $0x3c] sm:$0xf] %vm1350_vm3, %v1329_v52  ;;  %v1218_v56 = vmax.f32 %v1182_v53, %v1080_v51 }
 0x116   :  { %v1258_v57 = vadd.f32 %v2126_v50, %v1218_v56 }
 0x118   :  { %v1294_v58 = vmax.f32 %v1258_v57, 0.0 }
 0x119   :  { %v992_v60 = vpop.f32.mrf.mxu2  ;;  %v1082_v61 = vpop.f32.mrf.mxu3 }
 0x11a   :  { %v1330_v0 = vpack.c.bf16 %v1294_v58, %v1294_v58  ;;  %v1183_v1 = vmax.f32 %v1147_v59, %v992_v60  ;;  %v815_v2 = vpop.f32.mrf.mxu0  ;;  %v905_v3 = vpop.f32.mrf.mxu1 }
 0x11b   :  { %v1148_v8 = vmax.f32 %v815_v2, %v905_v3 }
 0x11c   :  { %1367 = vst.msk [vmem:[%s2455_s3 + $0x40] sm:$0xf] %vm1350_vm3, %v1330_v0  ;;  %v1219_v6 = vmax.f32 %v1183_v1, %v1082_v61 }
 0x11d   :  { %1812 = vmatmul.msk.bf16.gmra.mxu0 %vm537_vm2, %v1884_v62  ;;  %1830 = vmatmul.msk.bf16.gmra.mxu1 %vm537_vm2, %v1902_v63 }
 0x11e   :  { %v1259_v7 = vadd.f32 %v2126_v50, %v1219_v6  ;;  %1848 = vmatmul.msk.bf16.gmra.mxu2 %vm537_vm2, %v1920_v4  ;;  %1866 = vmatmul.msk.bf16.gmra.mxu3 %vm537_vm2, %v1938_v5 }
 0x120   :  { %v1295_v9 = vmax.f32 %v1259_v7, 0.0 }
 0x121   :  { %v995_v10 = vpop.f32.mrf.mxu2  ;;  %v1085_v11 = vpop.f32.mrf.mxu3 }
 0x122   :  { %v1331_v12 = vpack.c.bf16 %v1295_v9, %v1295_v9  ;;  %v1184_v13 = vmax.f32 %v1148_v8, %v995_v10  ;;  %v817_v14 = vpop.f32.mrf.mxu0  ;;  %v907_v15 = vpop.f32.mrf.mxu1 }
 0x123   :  { %v1149_v19 = vmax.f32 %v817_v14, %v907_v15 }
 0x124   :  { %1368 = vst.msk [vmem:[%s2455_s3 + $0x44] sm:$0xf] %vm1350_vm3, %v1331_v12  ;;  %v1220_v16 = vmax.f32 %v1184_v13, %v1085_v11 }
 0x126   :  { %v1260_v17 = vadd.f32 %v2126_v50, %v1220_v16 }
 0x128   :  { %v1296_v18 = vmax.f32 %v1260_v17, 0.0 }
 0x129   :  { %v997_v20 = vpop.f32.mrf.mxu2  ;;  %v1087_v21 = vpop.f32.mrf.mxu3 }
 0x12a   :  { %v1332_v22 = vpack.c.bf16 %v1296_v18, %v1296_v18  ;;  %v1185_v23 = vmax.f32 %v1149_v19, %v997_v20  ;;  %v820_v24 = vpop.f32.mrf.mxu0  ;;  %v910_v25 = vpop.f32.mrf.mxu1 }
 0x12b   :  { %v1150_v28 = vmax.f32 %v820_v24, %v910_v25 }
 0x12c   :  { %1369 = vst.msk [vmem:[%s2455_s3 + $0x48] sm:$0xf] %vm1350_vm3, %v1332_v22  ;;  %v1221_v26 = vmax.f32 %v1185_v23, %v1087_v21 }
 0x12e   :  { %v1261_v27 = vadd.f32 %v2126_v50, %v1221_v26 }
 0x130   :  { %v1297_v29 = vmax.f32 %v1261_v27, 0.0 }
 0x131   :  { %v1000_v30 = vpop.f32.mrf.mxu2  ;;  %v1090_v31 = vpop.f32.mrf.mxu3 }
 0x132   :  { %v1333_v32 = vpack.c.bf16 %v1297_v29, %v1297_v29  ;;  %v1186_v33 = vmax.f32 %v1150_v28, %v1000_v30  ;;  %v822_v34 = vpop.f32.mrf.mxu0  ;;  %v912_v35 = vpop.f32.mrf.mxu1 }
 0x133   :  { %v1151_v39 = vmax.f32 %v822_v34, %v912_v35 }
 0x134   :  { %1370 = vst.msk [vmem:[%s2455_s3 + $0x4c] sm:$0xf] %vm1350_vm3, %v1333_v32  ;;  %v1222_v36 = vmax.f32 %v1186_v33, %v1090_v31 }
 0x136   :  { %v1262_v37 = vadd.f32 %v2126_v50, %v1222_v36 }
 0x138   :  { %v1298_v38 = vmax.f32 %v1262_v37, 0.0 }
 0x139   :  { %v1002_v40 = vpop.f32.mrf.mxu2  ;;  %v1092_v41 = vpop.f32.mrf.mxu3 }
 0x13a   :  { %v1334_v42 = vpack.c.bf16 %v1298_v38, %v1298_v38  ;;  %v1187_v43 = vmax.f32 %v1151_v39, %v1002_v40  ;;  %v825_v44 = vpop.f32.mrf.mxu0  ;;  %v915_v45 = vpop.f32.mrf.mxu1 }
 0x13b   :  { %v1152_v48 = vmax.f32 %v825_v44, %v915_v45 }
 0x13c   :  { %1371 = vst.msk [vmem:[%s2455_s3 + $0x50] sm:$0xf] %vm1350_vm3, %v1334_v42  ;;  %v1223_v46 = vmax.f32 %v1187_v43, %v1092_v41 }
 0x13e   :  { %v1263_v47 = vadd.f32 %v2126_v50, %v1223_v46 }
 0x140   :  { %v1299_v49 = vmax.f32 %v1263_v47, 0.0 }
 0x141   :  { %v1005_v51 = vpop.f32.mrf.mxu2  ;;  %v1095_v52 = vpop.f32.mrf.mxu3 }
 0x142   :  { %v1335_v53 = vpack.c.bf16 %v1299_v49, %v1299_v49  ;;  %v1188_v54 = vmax.f32 %v1152_v48, %v1005_v51  ;;  %v827_v55 = vpop.f32.mrf.mxu0  ;;  %v917_v56 = vpop.f32.mrf.mxu1 }
 0x143   :  { %v1153_v60 = vmax.f32 %v827_v55, %v917_v56 }
 0x144   :  { %1372 = vst.msk [vmem:[%s2455_s3 + $0x54] sm:$0xf] %vm1350_vm3, %v1335_v53  ;;  %v1224_v57 = vmax.f32 %v1188_v54, %v1095_v52 }
 0x146   :  { %v1264_v58 = vadd.f32 %v2126_v50, %v1224_v57 }
 0x148   :  { %v1300_v59 = vmax.f32 %v1264_v58, 0.0 }
 0x149   :  { %v1007_v61 = vpop.f32.mrf.mxu2  ;;  %v1097_v62 = vpop.f32.mrf.mxu3 }
 0x14a   :  { %v1336_v63 = vpack.c.bf16 %v1300_v59, %v1300_v59  ;;  %v1189_v0 = vmax.f32 %v1153_v60, %v1007_v61  ;;  %v830_v1 = vpop.f32.mrf.mxu0  ;;  %v920_v2 = vpop.f32.mrf.mxu1 }
 0x14b   :  { %v1154_v5 = vmax.f32 %v830_v1, %v920_v2 }
 0x14c   :  { %1373 = vst.msk [vmem:[%s2455_s3 + $0x58] sm:$0xf] %vm1350_vm3, %v1336_v63  ;;  %v1225_v3 = vmax.f32 %v1189_v0, %v1097_v62 }
 0x14e   :  { %v1265_v4 = vadd.f32 %v2126_v50, %v1225_v3 }
 0x150   :  { %v1301_v6 = vmax.f32 %v1265_v4, 0.0 }
 0x151   :  { %v1010_v7 = vpop.f32.mrf.mxu2  ;;  %v1100_v8 = vpop.f32.mrf.mxu3 }
 0x152   :  { %v1337_v9 = vpack.c.bf16 %v1301_v6, %v1301_v6  ;;  %v1190_v10 = vmax.f32 %v1154_v5, %v1010_v7  ;;  %v832_v11 = vpop.f32.mrf.mxu0  ;;  %v922_v12 = vpop.f32.mrf.mxu1 }
 0x153   :  { %v1155_v16 = vmax.f32 %v832_v11, %v922_v12 }
 0x154   :  { %1374 = vst.msk [vmem:[%s2455_s3 + $0x5c] sm:$0xf] %vm1350_vm3, %v1337_v9  ;;  %v1226_v13 = vmax.f32 %v1190_v10, %v1100_v8 }
 0x156   :  { %v1266_v14 = vadd.f32 %v2126_v50, %v1226_v13 }
 0x158   :  { %v1302_v15 = vmax.f32 %v1266_v14, 0.0 }
 0x159   :  { %v1012_v17 = vpop.f32.mrf.mxu2  ;;  %v1102_v18 = vpop.f32.mrf.mxu3 }
 0x15a   :  { %v1338_v19 = vpack.c.bf16 %v1302_v15, %v1302_v15  ;;  %v1191_v20 = vmax.f32 %v1155_v16, %v1012_v17  ;;  %v835_v21 = vpop.f32.mrf.mxu0  ;;  %v925_v22 = vpop.f32.mrf.mxu1 }
 0x15b   :  { %v1156_v25 = vmax.f32 %v835_v21, %v925_v22 }
 0x15c   :  { %1375 = vst.msk [vmem:[%s2455_s3 + $0x60] sm:$0xf] %vm1350_vm3, %v1338_v19  ;;  %v1227_v23 = vmax.f32 %v1191_v20, %v1102_v18 }
 0x15e   :  { %v1267_v24 = vadd.f32 %v2126_v50, %v1227_v23 }
 0x160   :  { %v1303_v26 = vmax.f32 %v1267_v24, 0.0 }
 0x161   :  { %v1015_v27 = vpop.f32.mrf.mxu2  ;;  %v1105_v28 = vpop.f32.mrf.mxu3 }
 0x162   :  { %v1339_v29 = vpack.c.bf16 %v1303_v26, %v1303_v26  ;;  %v1192_v30 = vmax.f32 %v1156_v25, %v1015_v27  ;;  %v837_v31 = vpop.f32.mrf.mxu0  ;;  %v927_v32 = vpop.f32.mrf.mxu1 }
 0x163   :  { %v1157_v36 = vmax.f32 %v837_v31, %v927_v32 }
 0x164   :  { %1376 = vst.msk [vmem:[%s2455_s3 + $0x64] sm:$0xf] %vm1350_vm3, %v1339_v29  ;;  %v1228_v33 = vmax.f32 %v1192_v30, %v1105_v28 }
 0x166   :  { %v1268_v34 = vadd.f32 %v2126_v50, %v1228_v33 }
 0x168   :  { %v1304_v35 = vmax.f32 %v1268_v34, 0.0 }
 0x169   :  { %v1017_v37 = vpop.f32.mrf.mxu2  ;;  %v1107_v38 = vpop.f32.mrf.mxu3 }
 0x16a   :  { %v1340_v39 = vpack.c.bf16 %v1304_v35, %v1304_v35  ;;  %v1193_v40 = vmax.f32 %v1157_v36, %v1017_v37  ;;  %v840_v41 = vpop.f32.mrf.mxu0  ;;  %v930_v42 = vpop.f32.mrf.mxu1 }
 0x16b   :  { %v1158_v45 = vmax.f32 %v840_v41, %v930_v42 }
 0x16c   :  { %1377 = vst.msk [vmem:[%s2455_s3 + $0x68] sm:$0xf] %vm1350_vm3, %v1340_v39  ;;  %v1229_v43 = vmax.f32 %v1193_v40, %v1107_v38 }
 0x16e   :  { %v1269_v44 = vadd.f32 %v2126_v50, %v1229_v43 }
 0x170   :  { %v1305_v46 = vmax.f32 %v1269_v44, 0.0 }
 0x171   :  { %v1020_v47 = vpop.f32.mrf.mxu2  ;;  %v1110_v48 = vpop.f32.mrf.mxu3 }
 0x172   :  { %v1341_v49 = vpack.c.bf16 %v1305_v46, %v1305_v46  ;;  %v1194_v51 = vmax.f32 %v1158_v45, %v1020_v47  ;;  %v842_v52 = vpop.f32.mrf.mxu0  ;;  %v932_v53 = vpop.f32.mrf.mxu1 }
 0x173   :  { %v1159_v57 = vmax.f32 %v842_v52, %v932_v53 }
 0x174   :  { %1378 = vst.msk [vmem:[%s2455_s3 + $0x6c] sm:$0xf] %vm1350_vm3, %v1341_v49  ;;  %v1230_v54 = vmax.f32 %v1194_v51, %v1110_v48 }
 0x176   :  { %v1270_v55 = vadd.f32 %v2126_v50, %v1230_v54 }
 0x178   :  { %v1306_v56 = vmax.f32 %v1270_v55, 0.0 }
 0x179   :  { %v1022_v58 = vpop.f32.mrf.mxu2  ;;  %v1112_v59 = vpop.f32.mrf.mxu3 }
 0x17a   :  { %v1342_v60 = vpack.c.bf16 %v1306_v56, %v1306_v56  ;;  %v1195_v61 = vmax.f32 %v1159_v57, %v1022_v58  ;;  %v845_v62 = vpop.f32.mrf.mxu0  ;;  %v935_v63 = vpop.f32.mrf.mxu1 }
 0x17b   :  { %v1160_v2 = vmax.f32 %v845_v62, %v935_v63 }
 0x17c   :  { %1379 = vst.msk [vmem:[%s2455_s3 + $0x70] sm:$0xf] %vm1350_vm3, %v1342_v60  ;;  %v1231_v0 = vmax.f32 %v1195_v61, %v1112_v59 }
 0x17e   :  { %v1271_v1 = vadd.f32 %v2126_v50, %v1231_v0 }
 0x180   :  { %v1307_v3 = vmax.f32 %v1271_v1, 0.0 }
 0x181   :  { %v1025_v4 = vpop.f32.mrf.mxu2  ;;  %v1115_v5 = vpop.f32.mrf.mxu3 }
 0x182   :  { %v1343_v6 = vpack.c.bf16 %v1307_v3, %v1307_v3  ;;  %v1196_v7 = vmax.f32 %v1160_v2, %v1025_v4  ;;  %v847_v8 = vpop.f32.mrf.mxu0  ;;  %v937_v9 = vpop.f32.mrf.mxu1 }
 0x183   :  { %v1161_v13 = vmax.f32 %v847_v8, %v937_v9 }
 0x184   :  { %1380 = vst.msk [vmem:[%s2455_s3 + $0x74] sm:$0xf] %vm1350_vm3, %v1343_v6  ;;  %v1232_v10 = vmax.f32 %v1196_v7, %v1115_v5 }
 0x186   :  { %v1272_v11 = vadd.f32 %v2126_v50, %v1232_v10 }
 0x188   :  { %v1308_v12 = vmax.f32 %v1272_v11, 0.0 }
 0x189   :  { %v1027_v14 = vpop.f32.mrf.mxu2  ;;  %v1117_v15 = vpop.f32.mrf.mxu3 }
 0x18a   :  { %v1344_v16 = vpack.c.bf16 %v1308_v12, %v1308_v12  ;;  %v1197_v17 = vmax.f32 %v1161_v13, %v1027_v14  ;;  %v850_v18 = vpop.f32.mrf.mxu0  ;;  %v940_v19 = vpop.f32.mrf.mxu1 }
 0x18b   :  { %v1162_v22 = vmax.f32 %v850_v18, %v940_v19 }
 0x18c   :  { %1381 = vst.msk [vmem:[%s2455_s3 + $0x78] sm:$0xf] %vm1350_vm3, %v1344_v16  ;;  %v1233_v20 = vmax.f32 %v1197_v17, %v1117_v15 }
 0x18e   :  { %v1273_v21 = vadd.f32 %v2126_v50, %v1233_v20 }
 0x190   :  { %v1309_v23 = vmax.f32 %v1273_v21, 0.0 }
 0x191   :  { %v1030_v24 = vpop.f32.mrf.mxu2  ;;  %v1120_v25 = vpop.f32.mrf.mxu3 }
 0x192   :  { %v1345_v26 = vpack.c.bf16 %v1309_v23, %v1309_v23  ;;  %v1198_v27 = vmax.f32 %v1162_v22, %v1030_v24  ;;  %v852_v28 = vpop.f32.mrf.mxu0  ;;  %v942_v29 = vpop.f32.mrf.mxu1 }
 0x193   :  { %v1163_v33 = vmax.f32 %v852_v28, %v942_v29 }
 0x194   :  { %1382 = vst.msk [vmem:[%s2455_s3 + $0x7c] sm:$0xf] %vm1350_vm3, %v1345_v26  ;;  %v1234_v30 = vmax.f32 %v1198_v27, %v1120_v25 }
 0x196   :  { %v1274_v31 = vadd.f32 %v2126_v50, %v1234_v30 }
 0x198   :  { %v1310_v32 = vmax.f32 %v1274_v31, 0.0 }
 0x199   :  { %v1032_v34 = vpop.f32.mrf.mxu2  ;;  %v1122_v35 = vpop.f32.mrf.mxu3 }
 0x19a   :  { %v1346_v36 = vpack.c.bf16 %v1310_v32, %v1310_v32  ;;  %v1199_v37 = vmax.f32 %v1163_v33, %v1032_v34  ;;  %v855_v38 = vpop.f32.mrf.mxu0  ;;  %v945_v39 = vpop.f32.mrf.mxu1 }
 0x19b   :  { %v1164_v42 = vmax.f32 %v855_v38, %v945_v39 }
 0x19c   :  { %1383 = vst.msk [vmem:[%s2455_s3 + $0x80] sm:$0xf] %vm1350_vm3, %v1346_v36  ;;  %v1235_v40 = vmax.f32 %v1199_v37, %v1122_v35 }
 0x19e   :  { %v1275_v41 = vadd.f32 %v2126_v50, %v1235_v40 }
 0x1a0   :  { %v1311_v43 = vmax.f32 %v1275_v41, 0.0 }
 0x1a1   :  { %v1035_v44 = vpop.f32.mrf.mxu2  ;;  %v1125_v45 = vpop.f32.mrf.mxu3 }
 0x1a2   :  { %v1347_v46 = vpack.c.bf16 %v1311_v43, %v1311_v43  ;;  %v1200_v47 = vmax.f32 %v1164_v42, %v1035_v44  ;;  %v857_v49 = vpop.f32.mrf.mxu0  ;;  %v947_v51 = vpop.f32.mrf.mxu1 }
 0x1a3   :  { %v1165_v54 = vmax.f32 %v857_v49, %v947_v51 }
 0x1a4   :  { %1384 = vst.msk [vmem:[%s2455_s3 + $0x84] sm:$0xf] %vm1350_vm3, %v1347_v46  ;;  %v1236_v48 = vmax.f32 %v1200_v47, %v1125_v45 }
 0x1a6   :  { %v1276_v52 = vadd.f32 %v2126_v50, %v1236_v48 }
 0x1a8   :  { %v1312_v53 = vmax.f32 %v1276_v52, 0.0 }
 0x1a9   :  { %v1037_v55 = vpop.f32.mrf.mxu2  ;;  %v1127_v58 = vpop.f32.mrf.mxu3 }
 0x1aa   :  { %v1348_v56 = vpack.c.bf16 %v1312_v53, %v1312_v53  ;;  %v1201_v57 = vmax.f32 %v1165_v54, %v1037_v55 }
 0x1ac   :  { %1385 = vst.msk [vmem:[%s2455_s3 + $0x88] sm:$0xf] %vm1350_vm3, %v1348_v56  ;;  %v1237_v59 = vmax.f32 %v1201_v57, %v1127_v58 }
 0x1ae   :  { %v1277_v60 = vadd.f32 %v2126_v50, %v1237_v59 }
 0x1b0   :  { %v1313_v61 = vmax.f32 %v1277_v60, 0.0 }
 0x1b2   :  { %v1349_v62 = vpack.c.bf16 %v1313_v61, %v1313_v61 }
 0x1b4   :  { %1386 = vst.msk [vmem:[%s2455_s3 + $0x8c] sm:$0xf] %vm1350_vm3, %v1349_v62 }

// kernel: net_forward.4
= control target key start
LH: loop header
LB: loop body
LE: loop exit
PB: predicated region body
PF: predicated region fallthrough
CT: control target
= control target key end

     0   :  { %vm257_vm0 = vcmask 1044480   ;;  %vm232_vm1 = vcmask 998400   ;;  %vm387_vm2 = vcmask 158720   ;;  %s787_s1 = inlined_call_operand.vmem [shape: bf16[250,20], index: 1, kind: input, shape index: {}]   ;;  %s788_s0 = inlined_call_operand.vmem [shape: bf16[4,32,250], index: 0, kind: input, shape index: {}]   ;;  %s789_s2 = inlined_call_operand.vmem [shape: f32[1,20], index: 2, kind: input, shape index: {}]   ;;  %s790_s3 = inlined_call_operand.vmem [shape: bf16[32,20], index: 3, kind: output, shape index: {}]  }
   0x1   :  { %v567_v0 = vld [vmem:[%s787_s1 + $0x38] sm:$0xff]  ;;  %v566_v4 = vld [vmem:[%s787_s1 + $0x30] sm:$0xff]  ;;  %v565_v7 = vld [vmem:[%s787_s1 + $0x28] sm:$0xff] }
   0x2   :  { %v534_v1 = vld [vmem:[%s787_s1 + $0x78] sm:$0xf]  ;;  %v575_v2 = vld [vmem:[%s787_s1 + $0x78] sm:$0x10]  ;;  %261 = vmatpush.bf16.msra.mxu0 %v567_v0  ;;  %576 = vmatpush.bf16.msra.mxu2 %v567_v0  ;;  %v574_v6 = vld [vmem:[%s787_s1 + $0x70] sm:$0xff] }
   0x3   :  { %v535_v3 = vor.u32 %v575_v2, %v534_v1  ;;  %v573_v8 = vld [vmem:[%s787_s1 + $0x68] sm:$0xff]  ;;  %v564_v9 = vld [vmem:[%s787_s1 + $0x20] sm:$0xff]  ;;  %v563_v11 = vld [vmem:[%s787_s1 + $0x18] sm:$0xff] }
   0x4   :  { %v572_v10 = vld [vmem:[%s787_s1 + $0x60] sm:$0xff]  ;;  %v571_v12 = vld [vmem:[%s787_s1 + $0x58] sm:$0xff]  ;;  %v562_v13 = vld [vmem:[%s787_s1 + $0x10] sm:$0xff] }
   0x5   :  { %v259_v5 = vsel %vm257_vm0, %v535_v3, 0  ;;  %v570_v14 = vld [vmem:[%s787_s1 + $0x50] sm:$0xff]  ;;  %v561_v15 = vld [vmem:[%s787_s1 + $0x8] sm:$0xff]  ;;  %v560_v17 = vld [vmem:[%s787_s1] sm:$0xff] }
   0x6   :  { %310 = vmatpush.bf16.msra.mxu1 %v259_v5  ;;  %584 = vmatpush.bf16.msra.mxu3 %v259_v5  ;;  %v569_v16 = vld [vmem:[%s787_s1 + $0x48] sm:$0xff]  ;;  %v410_v18 = vld [vmem:[%s788_s0] sm:$0xf]  ;;  %v544_v23 = vld [vmem:[%s788_s0 + $0x4] sm:$0xf] }
   0x7   :  { %262 = vmatpush.bf16.msra.mxu0 %v566_v4  ;;  %577 = vmatpush.bf16.msra.mxu2 %v566_v4  ;;  %v545_v19 = vld [vmem:[%s788_s0 + $0x4] sm:$0xf0]  ;;  %v442_v20 = vld [vmem:[%s788_s0 + $0x40] sm:$0xf]  ;;  %v412_v24 = vld [vmem:[%s788_s0 + $0x8] sm:$0xf0] }
   0x8   :  { %v553_v21 = vld [vmem:[%s788_s0 + $0x44] sm:$0xf0]  ;;  %v568_v22 = vld [vmem:[%s787_s1 + $0x40] sm:$0xff]  ;;  %v444_v26 = vld [vmem:[%s788_s0 + $0x48] sm:$0xf0]  ;;  %v411_v27 = vor.u32 %v545_v19, %v410_v18  ;;  %v415_v29 = vor.u32 %v544_v23, %v412_v24 }
   0x9   :  { %v552_v25 = vld [vmem:[%s788_s0 + $0x44] sm:$0xf]  ;;  %v443_v28 = vor.u32 %v553_v21, %v442_v20  ;;  %v418_v31 = vld [vmem:[%s788_s0 + $0x10] sm:$0xf]  ;;  %v547_v32 = vld [vmem:[%s788_s0 + $0x14] sm:$0xf0] }
   0xa   :  { %311 = vmatpush.bf16.msra.mxu1 %v574_v6  ;;  %585 = vmatpush.bf16.msra.mxu3 %v574_v6  ;;  %v447_v30 = vor.u32 %v552_v25, %v444_v26  ;;  %v450_v33 = vld [vmem:[%s788_s0 + $0x50] sm:$0xf]  ;;  %v555_v34 = vld [vmem:[%s788_s0 + $0x54] sm:$0xf0]  ;;  %v546_v35 = vld [vmem:[%s788_s0 + $0x14] sm:$0xf]  ;;  %v419_v39 = vor.u32 %v547_v32, %v418_v31 }
   0xb   :  { %263 = vmatpush.bf16.msra.mxu0 %v565_v7  ;;  %578 = vmatpush.bf16.msra.mxu2 %v565_v7  ;;  %v420_v36 = vld [vmem:[%s788_s0 + $0x18] sm:$0xf0]  ;;  %v554_v37 = vld [vmem:[%s788_s0 + $0x54] sm:$0xf]  ;;  %v451_v40 = vor.u32 %v555_v34, %v450_v33  ;;  %v426_v43 = vld [vmem:[%s788_s0 + $0x20] sm:$0xf] }
   0xc   :  { %v452_v38 = vld [vmem:[%s788_s0 + $0x58] sm:$0xf0]  ;;  %v423_v41 = vor.u32 %v546_v35, %v420_v36  ;;  %v549_v44 = vld [vmem:[%s788_s0 + $0x24] sm:$0xf0]  ;;  %v458_v45 = vld [vmem:[%s788_s0 + $0x60] sm:$0xf] }
   0xd   :  { %v455_v42 = vor.u32 %v554_v37, %v452_v38  ;;  %v557_v46 = vld [vmem:[%s788_s0 + $0x64] sm:$0xf0]  ;;  %v548_v47 = vld [vmem:[%s788_s0 + $0x24] sm:$0xf]  ;;  %v428_v48 = vld [vmem:[%s788_s0 + $0x28] sm:$0xf0]  ;;  %v427_v51 = vor.u32 %v549_v44, %v426_v43 }
   0xe   :  { %312 = vmatpush.bf16.msra.mxu1 %v573_v8  ;;  %586 = vmatpush.bf16.msra.mxu3 %v573_v8  ;;  %v556_v49 = vld [vmem:[%s788_s0 + $0x64] sm:$0xf]  ;;  %v460_v50 = vld [vmem:[%s788_s0 + $0x68] sm:$0xf0]  ;;  %v459_v52 = vor.u32 %v557_v46, %v458_v45  ;;  %v431_v53 = vor.u32 %v548_v47, %v428_v48  ;;  %v434_v55 = vld [vmem:[%s788_s0 + $0x30] sm:$0xf] }
   0xf   :  { %264 = vmatpush.bf16.msra.mxu0 %v564_v9  ;;  %579 = vmatpush.bf16.msra.mxu2 %v564_v9  ;;  %v463_v54 = vor.u32 %v556_v49, %v460_v50  ;;  %v551_v56 = vld [vmem:[%s788_s0 + $0x34] sm:$0xf0]  ;;  %v466_v57 = vld [vmem:[%s788_s0 + $0x70] sm:$0xf]  ;;  %v550_v59 = vld [vmem:[%s788_s0 + $0x34] sm:$0xf] }
  0x10   :  { %v559_v58 = vld [vmem:[%s788_s0 + $0x74] sm:$0xf0]  ;;  %v436_v60 = vld [vmem:[%s788_s0 + $0x38] sm:$0xf0]  ;;  %v558_v61 = vld [vmem:[%s788_s0 + $0x74] sm:$0xf]  ;;  %v435_v63 = vor.u32 %v551_v56, %v434_v55 }
  0x11   :  { %v468_v62 = vld [vmem:[%s788_s0 + $0x78] sm:$0xf0]  ;;  %v467_v0 = vor.u32 %v559_v58, %v466_v57  ;;  %v439_v1 = vor.u32 %v550_v59, %v436_v60 }
  0x12   :  { %313 = vmatpush.bf16.msra.mxu1 %v572_v10  ;;  %587 = vmatpush.bf16.msra.mxu3 %v572_v10  ;;  %v471_v2 = vor.u32 %v558_v61, %v468_v62 }
  0x13   :  { %265 = vmatpush.bf16.msra.mxu0 %v563_v11  ;;  %580 = vmatpush.bf16.msra.mxu2 %v563_v11 }
  0x16   :  { %314 = vmatpush.bf16.msra.mxu1 %v571_v12  ;;  %588 = vmatpush.bf16.msra.mxu3 %v571_v12 }
  0x17   :  { %266 = vmatpush.bf16.msra.mxu0 %v562_v13  ;;  %581 = vmatpush.bf16.msra.mxu2 %v562_v13 }
  0x1a   :  { %315 = vmatpush.bf16.msra.mxu1 %v570_v14  ;;  %589 = vmatpush.bf16.msra.mxu3 %v570_v14 }
  0x1b   :  { %267 = vmatpush.bf16.msra.mxu0 %v561_v15  ;;  %582 = vmatpush.bf16.msra.mxu2 %v561_v15 }
  0x1e   :  { %316 = vmatpush.bf16.msra.mxu1 %v569_v16  ;;  %590 = vmatpush.bf16.msra.mxu3 %v569_v16 }
  0x1f   :  { %268 = vmatpush.bf16.msra.mxu0 %v560_v17  ;;  %583 = vmatpush.bf16.msra.mxu2 %v560_v17 }
  0x22   :  { %317 = vmatpush.bf16.msra.mxu1 %v568_v22  ;;  %591 = vmatpush.bf16.msra.mxu3 %v568_v22 }
  0x23   :  { %269 = vmatmul.bf16.vlgmr.msra.gmra.mxu0 %v411_v27  ;;  %289 = vmatmul.bf16.vlgmr.msra.gmra.mxu2 %v443_v28 }
  0x25   :  { %536 = vmatmul.msk.bf16.vlgmr.msra.gmra.mxu1 %vm232_vm1, %v415_v29  ;;  %540 = vmatmul.msk.bf16.vlgmr.msra.gmra.mxu3 %vm232_vm1, %v447_v30  ;;  %v592_v30 = vld [vmem:[%s789_s2] ss:$0 sm:$0xff] }
  0x33   :  { %274 = vmatmul.bf16.gmra.mxu0 %v419_v39  ;;  %294 = vmatmul.bf16.gmra.mxu2 %v451_v40 }
  0x35   :  { %537 = vmatmul.msk.bf16.gmra.mxu1 %vm232_vm1, %v423_v41  ;;  %541 = vmatmul.msk.bf16.gmra.mxu3 %vm232_vm1, %v455_v42 }
  0x43   :  { %279 = vmatmul.bf16.gmra.mxu0 %v427_v51  ;;  %299 = vmatmul.bf16.gmra.mxu2 %v459_v52 }
  0x45   :  { %538 = vmatmul.msk.bf16.gmra.mxu1 %vm232_vm1, %v431_v53  ;;  %542 = vmatmul.msk.bf16.gmra.mxu3 %vm232_vm1, %v463_v54 }
  0x53   :  { %284 = vmatmul.bf16.gmra.mxu0 %v435_v63  ;;  %304 = vmatmul.bf16.gmra.mxu2 %v467_v0 }
  0x55   :  { %539 = vmatmul.msk.bf16.gmra.mxu1 %vm232_vm1, %v439_v1  ;;  %543 = vmatmul.msk.bf16.gmra.mxu3 %vm232_vm1, %v471_v2 }
  0xa0   :  { %v270_v3 = vpop.f32.mrf.mxu0 }
  0xa2   :  { %v319_v4 = vpop.f32.mrf.mxu1 }
  0xa3   :  { %v320_v21 = vadd.f32 %v319_v4, %v270_v3 }
  0xa6   :  { %v290_v5 = vpop.f32.mrf.mxu2 }
  0xa8   :  { %v339_v6 = vpop.f32.mrf.mxu3  ;;  %v272_v7 = vpop.f32.mrf.mxu0 }
  0xa9   :  { %v340_v25 = vadd.f32 %v339_v6, %v290_v5 }
  0xaa   :  { %v321_v8 = vpop.f32.mrf.mxu1 }
  0xab   :  { %v322_v32 = vadd.f32 %v321_v8, %v272_v7 }
  0xae   :  { %v292_v9 = vpop.f32.mrf.mxu2 }
  0xb0   :  { %v341_v10 = vpop.f32.mrf.mxu3  ;;  %v275_v11 = vpop.f32.mrf.mxu0 }
  0xb1   :  { %v342_v38 = vadd.f32 %v341_v10, %v292_v9 }
  0xb2   :  { %v324_v12 = vpop.f32.mrf.mxu1 }
  0xb3   :  { %v325_v46 = vadd.f32 %v324_v12, %v275_v11 }
  0xb6   :  { %v295_v13 = vpop.f32.mrf.mxu2 }
  0xb8   :  { %v344_v14 = vpop.f32.mrf.mxu3  ;;  %v277_v15 = vpop.f32.mrf.mxu0 }
  0xb9   :  { %v345_v52 = vadd.f32 %v344_v14, %v295_v13 }
  0xba   :  { %v326_v16 = vpop.f32.mrf.mxu1 }
  0xbb   :  { %v327_v60 = vadd.f32 %v326_v16, %v277_v15 }
  0xbe   :  { %v297_v17 = vpop.f32.mrf.mxu2 }
  0xc0   :  { %v346_v18 = vpop.f32.mrf.mxu3  ;;  %v280_v19 = vpop.f32.mrf.mxu0 }
  0xc1   :  { %v347_v1 = vadd.f32 %v346_v18, %v297_v17 }
  0xc2   :  { %v329_v20 = vpop.f32.mrf.mxu1 }
  0xc3   :  { %v330_v22 = vadd.f32 %v329_v20, %v280_v19 }
  0xc5   :  { %v359_v23 = vmax.f32 %v320_v21, %v330_v22 }
  0xc6   :  { %v300_v24 = vpop.f32.mrf.mxu2 }
  0xc7   :  { %v363_v29 = vmax.f32 %v359_v23, %v340_v25 }
  0xc8   :  { %v349_v26 = vpop.f32.mrf.mxu3  ;;  %v282_v27 = vpop.f32.mrf.mxu0 }
  0xc9   :  { %v350_v28 = vadd.f32 %v349_v26, %v300_v24 }
  0xca   :  { %v331_v31 = vpop.f32.mrf.mxu1 }
  0xcb   :  { %v367_v33 = vmax.f32 %v363_v29, %v350_v28  ;;  %v332_v34 = vadd.f32 %v331_v31, %v282_v27 }
  0xcd   :  { %v375_v35 = vadd.f32 %v592_v30, %v367_v33  ;;  %v360_v36 = vmax.f32 %v322_v32, %v332_v34 }
  0xce   :  { %v302_v37 = vpop.f32.mrf.mxu2 }
  0xcf   :  { %v379_v39 = vmax.f32 %v375_v35, 0.0  ;;  %v364_v44 = vmax.f32 %v360_v36, %v342_v38 }
  0xd0   :  { %v351_v40 = vpop.f32.mrf.mxu3  ;;  %v285_v41 = vpop.f32.mrf.mxu0 }
  0xd1   :  { %v383_v42 = vpack.c.bf16 %v379_v39, %v379_v39  ;;  %v352_v43 = vadd.f32 %v351_v40, %v302_v37 }
  0xd2   :  { %v334_v45 = vpop.f32.mrf.mxu1 }
  0xd3   :  { %388 = vst.msk [vmem:[%s790_s3] sm:$0xf] %vm387_vm2, %v383_v42  ;;  %v368_v47 = vmax.f32 %v364_v44, %v352_v43  ;;  %v335_v48 = vadd.f32 %v334_v45, %v285_v41 }
  0xd5   :  { %v376_v49 = vadd.f32 %v592_v30, %v368_v47  ;;  %v361_v50 = vmax.f32 %v325_v46, %v335_v48 }
  0xd6   :  { %v305_v51 = vpop.f32.mrf.mxu2 }
  0xd7   :  { %v380_v53 = vmax.f32 %v376_v49, 0.0  ;;  %v365_v57 = vmax.f32 %v361_v50, %v345_v52 }
  0xd8   :  { %v354_v54 = vpop.f32.mrf.mxu3  ;;  %v287_v58 = vpop.f32.mrf.mxu0 }
  0xd9   :  { %v384_v55 = vpack.c.bf16 %v380_v53, %v380_v53  ;;  %v355_v56 = vadd.f32 %v354_v54, %v305_v51 }
  0xda   :  { %v336_v59 = vpop.f32.mrf.mxu1 }
  0xdb   :  { %389 = vst.msk [vmem:[%s790_s3 + $0x4] sm:$0xf] %vm387_vm2, %v384_v55  ;;  %v369_v61 = vmax.f32 %v365_v57, %v355_v56  ;;  %v337_v62 = vadd.f32 %v336_v59, %v287_v58 }
  0xdd   :  { %v377_v63 = vadd.f32 %v592_v30, %v369_v61  ;;  %v362_v0 = vmax.f32 %v327_v60, %v337_v62 }
  0xde   :  { %v307_v3 = vpop.f32.mrf.mxu2 }
  0xdf   :  { %v381_v2 = vmax.f32 %v377_v63, 0.0  ;;  %v366_v7 = vmax.f32 %v362_v0, %v347_v1 }
  0xe0   :  { %v356_v4 = vpop.f32.mrf.mxu3 }
  0xe1   :  { %v385_v5 = vpack.c.bf16 %v381_v2, %v381_v2  ;;  %v357_v6 = vadd.f32 %v356_v4, %v307_v3 }
  0xe3   :  { %390 = vst.msk [vmem:[%s790_s3 + $0x8] sm:$0xf] %vm387_vm2, %v385_v5  ;;  %v370_v8 = vmax.f32 %v366_v7, %v357_v6 }
  0xe5   :  { %v378_v9 = vadd.f32 %v592_v30, %v370_v8 }
  0xe7   :  { %v382_v10 = vmax.f32 %v378_v9, 0.0 }
  0xe9   :  { %v386_v11 = vpack.c.bf16 %v382_v10, %v382_v10 }
  0xeb   :  { %391 = vst.msk [vmem:[%s790_s3 + $0xc] sm:$0xf] %vm387_vm2, %v386_v11 }

// kernel: net_forward.5
= control target key start
LH: loop header
LB: loop body
LE: loop exit
PB: predicated region body
PF: predicated region fallthrough
CT: control target
= control target key end

     0   :  { %vm197_vm0 = vcmask 523264   ;;  %vm278_vm1 = vcmask 1040384   ;;  %vm274_vm2 = vcmask 408576   ;;  %vm295_vm3 = vcmask 80896   ;;  %s557_s1 = inlined_call_operand.vmem [shape: bf16[320,50], index: 1, kind: input, shape index: {}]   ;;  %s558_s0 = inlined_call_operand.vmem [shape: bf16[8,320], index: 0, kind: input, shape index: {}]   ;;  %s559_s2 = inlined_call_operand.vmem [shape: f32[1,50], index: 2, kind: input, shape index: {}]   ;;  %s560_s4 = inlined_call_operand.vmem [shape: f32[1,10], index: 4, kind: input, shape index: {}]   ;;  %s561_s3 = inlined_call_operand.vmem [shape: bf16[50,10], index: 3, kind: input, shape index: {}]   ;;  %s562_s5 = inlined_call_operand.vmem [shape: f32[8,10], index: 5, kind: output, shape index: {}]  }
   0x1   :  { %v415_v0 = vld [vmem:[%s557_s1 + $0x38] sm:$0xff]  ;;  %v414_v3 = vld [vmem:[%s557_s1 + $0x30] sm:$0xff]  ;;  %v413_v6 = vld [vmem:[%s557_s1 + $0x28] sm:$0xff] }
   0x2   :  { %v423_v1 = vld [vmem:[%s557_s1 + $0x78] sm:$0xff]  ;;  %201 = vmatpush.bf16.msra.mxu0 %v415_v0  ;;  %v422_v4 = vld [vmem:[%s557_s1 + $0x70] sm:$0xff]  ;;  %v421_v7 = vld [vmem:[%s557_s1 + $0x68] sm:$0xff] }
   0x3   :  { %v427_v2 = vld [vmem:[%s557_s1 + $0x98] sm:$0xff]  ;;  %214 = vmatpush.bf16.msra.mxu1 %v423_v1  ;;  %v426_v5 = vld [vmem:[%s557_s1 + $0x90] sm:$0xff]  ;;  %v425_v8 = vld [vmem:[%s557_s1 + $0x88] sm:$0xff] }
   0x4   :  { %231 = vmatpush.bf16.msra.mxu2 %v427_v2  ;;  %v22_v9 = vld [vmem:[%s558_s0 + $0x8] sm:$0xf]  ;;  %v412_v10 = vld [vmem:[%s557_s1 + $0x20] sm:$0xff]  ;;  %v411_v14 = vld [vmem:[%s557_s1 + $0x18] sm:$0xff] }
   0x5   :  { %v420_v11 = vld [vmem:[%s557_s1 + $0x60] sm:$0xff]  ;;  %v71_v13 = vunpack.c.l.b16 %v22_v9  ;;  %v419_v15 = vld [vmem:[%s557_s1 + $0x58] sm:$0xff]  ;;  %v410_v17 = vld [vmem:[%s557_s1 + $0x10] sm:$0xff] }
   0x6   :  { %202 = vmatpush.bf16.msra.mxu0 %v414_v3  ;;  %v424_v12 = vld [vmem:[%s557_s1 + $0x80] sm:$0xff]  ;;  %v418_v18 = vld [vmem:[%s557_s1 + $0x50] sm:$0xff]  ;;  %v409_v19 = vld [vmem:[%s557_s1 + $0x8] sm:$0xff] }
   0x7   :  { %215 = vmatpush.bf16.msra.mxu1 %v422_v4  ;;  %v74_v16 = vpack.c.b16 %v71_v13, %v71_v13  ;;  %v417_v20 = vld [vmem:[%s557_s1 + $0x48] sm:$0xff]  ;;  %v21_v21 = vld [vmem:[%s558_s0] sm:$0xff]  ;;  %v248_v28 = vld [vmem:[%s561_s3 + $0x18] sm:$0x1] }
   0x8   :  { %232 = vmatpush.bf16.msra.mxu2 %v426_v5  ;;  %v69_v22 = vunpack.c.l.b16 %v21_v21  ;;  %v70_v23 = vunpack.c.h.b16 %v21_v21  ;;  %v408_v24 = vld [vmem:[%s557_s1] sm:$0xff]  ;;  %v266_v29 = vunpack.c.l.b16 %v248_v28  ;;  %v430_v32 = vld [vmem:[%s561_s3 + $0x10] sm:$0xff]  ;;  %v429_v33 = vld [vmem:[%s561_s3 + $0x8] sm:$0xff] }
   0x9   :  { %v416_v25 = vld [vmem:[%s557_s1 + $0x40] sm:$0xff] }
   0xa   :  { %203 = vmatpush.bf16.msra.mxu0 %v413_v6  ;;  %v72_v26 = vpack.c.b16 %v69_v22, %v69_v22  ;;  %v73_v27 = vpack.c.b16 %v70_v23, %v70_v23  ;;  %v270_v30 = vpack.c.b16 %v266_v29, %v266_v29  ;;  %v428_v34 = vld [vmem:[%s561_s3] sm:$0xff] }
   0xb   :  { %216 = vmatpush.bf16.msra.mxu1 %v421_v7  ;;  %v431_v36 = vld [vmem:[%s559_s2] ss:$0 sm:$0xff] }
   0xc   :  { %233 = vmatpush.bf16.msra.mxu2 %v425_v8  ;;  %v280_v31 = vsel %vm278_vm1, %v270_v30, 0  ;;  %v432_v47 = vld [vmem:[%s560_s4] ss:$0 sm:$0xff] }
   0xd   :  { %286 = vmatpush.bf16.msra.mxu3 %v280_v31 }
   0xe   :  { %204 = vmatpush.bf16.msra.mxu0 %v412_v10 }
   0xf   :  { %217 = vmatpush.bf16.msra.mxu1 %v420_v11 }
  0x10   :  { %234 = vmatpush.bf16.msra.mxu2 %v424_v12 }
  0x11   :  { %287 = vmatpush.bf16.msra.mxu3 %v430_v32 }
  0x12   :  { %205 = vmatpush.bf16.msra.mxu0 %v411_v14 }
  0x13   :  { %218 = vmatpush.bf16.msra.mxu1 %v419_v15  ;;  %394 = vmatmul.msk.bf16.vlgmr.msra.gmra.mxu2 %vm197_vm0, %v74_v16 }
  0x15   :  { %288 = vmatpush.bf16.msra.mxu3 %v429_v33 }
  0x16   :  { %206 = vmatpush.bf16.msra.mxu0 %v410_v17 }
  0x17   :  { %219 = vmatpush.bf16.msra.mxu1 %v418_v18 }
  0x19   :  { %289 = vmatpush.bf16.msra.mxu3 %v428_v34 }
  0x1a   :  { %207 = vmatpush.bf16.msra.mxu0 %v409_v19 }
  0x1b   :  { %220 = vmatpush.bf16.msra.mxu1 %v417_v20 }
  0x1e   :  { %208 = vmatpush.bf16.msra.mxu0 %v408_v24 }
  0x1f   :  { %221 = vmatpush.bf16.msra.mxu1 %v416_v25 }
  0x21   :  { %209 = vmatmul.bf16.vlgmr.msra.gmra.mxu0 %v72_v26 }
  0x22   :  { %222 = vmatmul.bf16.vlgmr.msra.gmra.mxu1 %v73_v27 }
  0x96   :  { %v236_v35 = vpop.f32.mrf.mxu2 }
  0x9e   :  { %v210_v37 = vpop.f32.mrf.mxu0  ;;  %v238_v40 = vpop.f32.mrf.mxu2 }
  0x9f   :  { %v223_v38 = vpop.f32.mrf.mxu1  ;;  %v211_v39 = vadd.f32 %v431_v36, %v210_v37 }
  0xa1   :  { %v224_v41 = vadd.f32 %v223_v38, %v211_v39 }
  0xa3   :  { %v237_v42 = vadd.f32 %v236_v35, %v224_v41 }
  0xa5   :  { %v240_v43 = vmax.f32 %v237_v42, 0.0 }
  0xa6   :  { %v212_v44 = vpop.f32.mrf.mxu0 }
  0xa7   :  { %v225_v45 = vpop.f32.mrf.mxu1  ;;  %v241_v46 = vpack.c.bf16 %v240_v43, %v240_v43 }
  0xa9   :  { %407 = vmatmul.msk.bf16.vlgmr.msra.gmra.mxu3 %vm274_vm2, %v241_v46 }
 0x12c   :  { %v291_v48 = vpop.f32.mrf.mxu3 }
 0x12d   :  { %v292_v49 = vadd.f32 %v432_v47, %v291_v48 }
 0x12f   :  { %v296_v50 = vsel %vm295_vm3, %v292_v49, -inf }
 0x130   :  { %297 = vmax.xlane.f32.xlu0 %v296_v50 }
 0x134   :  { %v293_v51 = vpop.f32.mrf.mxu3 }
 0x1a3   :  { %v298_v52 = vpop.xlane.xlu0 %297 }
 0x1a4   :  { %v299_v53 = vsub.f32 %v292_v49, %v298_v52 }
 0x1a6   :  { %v300_v54 = vmul.f32 1.442695, %v299_v53 }
 0x1a8   :  { %433 = vpow2.f32 %v300_v54 }
 0x1ae   :  { %v434_v55 = vpop.eup %433 }
 0x1af   :  { %v302_v56 = vsel %vm295_vm3, %v434_v55, 0.0 }
 0x1b0   :  { %303 = vadd.xlane.f32.xlu0 %v302_v56 }
 0x223   :  { %v304_v57 = vpop.xlane.xlu0 %303 }
 0x224   :  { %435 = vlog2.f32 %v304_v57 }
 0x22a   :  { %v436_v58 = vpop.eup %435 }
 0x22b   :  { %v306_v59 = vmul.f32 0.6931472, %v436_v58 }
 0x22d   :  { %v307_v60 = vadd.f32 %v306_v59, %v298_v52 }
 0x22f   :  { %v308_v61 = vsub.f32 %v292_v49, %v307_v60 }
 0x231   :  { %309 = vst.msk [vmem:[%s562_s5] sm:$0xff] %vm295_vm3, %v308_v61 }

</bundles_post_ra>
